<compile_context>
chip_gen: v7x
topology: tpu7x:2x2x1
jax: 0.10.0
libtpu: 0.0.40
codegen_flags: <defaults>
</compile_context>

<pallas_src>
import functools
import math

import jax
import jax.numpy as jnp
from jax.experimental import pallas as pl
from jax.experimental.pallas import tpu as pltpu


# --------------------------------------------------------------------------- #
# Constants for the fused dBZ -> rain-rate epilogue:
#   (10 ** (x / 10) / 200) ** (5/8)  ==  exp(x * 0.625*ln(10)/10) * 200**(-0.625)
# --------------------------------------------------------------------------- #
_DBZ_SCALE = 0.625 * math.log(10.0) / 10.0
_DBZ_GAIN = float(200.0 ** (-0.625))


# --------------------------------------------------------------------------- #
# Pallas kernels
# --------------------------------------------------------------------------- #
def _mm_bias_kernel(a_ref, b_ref, bias_ref, o_ref, *, act):
    """o = a @ b + bias (lane dim = M), optional LeakyReLU(0.2) and dBZ->rain."""
    out = jnp.dot(a_ref[...], b_ref[...], preferred_element_type=jnp.float32)
    out = out + bias_ref[...]                     # bias (P,1) broadcasts over lanes
    if act in ("lrelu", "lrelu_dbz"):
        out = jnp.where(out >= 0.0, out, 0.2 * out)
    if act == "lrelu_dbz":
        out = jnp.exp(out * _DBZ_SCALE) * _DBZ_GAIN
    o_ref[...] = out


def pallas_matmul_bias(a, b, bias, act=None):
    """a: (P, K), b: (K, M), bias: (P, 1) -> (P, M) float32 (lane dim = M).

    Operands are fed to the MXU in bf16; accumulation and epilogue are f32.
    The M axis is gridded and marked "parallel" (v7x dual-TensorCore sharding).
    """
    P, K = a.shape
    _, M = b.shape
    if M % 256 == 0:
        tm = 256
    elif M % 128 == 0:
        tm = 128
    else:
        tm = M                                   # full-dim block (small tail cases)
    grid = (M // tm,)
    return pl.pallas_call(
        functools.partial(_mm_bias_kernel, act=act),
        out_shape=jax.ShapeDtypeStruct((P, M), jnp.float32),
        grid_spec=pltpu.PrefetchScalarGridSpec(
            num_scalar_prefetch=0,
            grid=grid,
            in_specs=[pl.BlockSpec((P, K), lambda i: (0, 0)),
                      pl.BlockSpec((K, tm), lambda i: (0, i)),
                      pl.BlockSpec((P, 1), lambda i: (0, 0))],
            out_specs=pl.BlockSpec((P, tm), lambda i: (0, i))),
        compiler_params=pltpu.CompilerParams(dimension_semantics=("parallel",)),
    )(a.astype(jnp.bfloat16), b.astype(jnp.bfloat16), bias.astype(jnp.float32))


def _convgru_kernel(colsx_ref, colsh_ref,
                    wxz_ref, wxr_ref, wxh_ref,
                    whz_ref, whr_ref, whh_ref,
                    bz_ref, br_ref, bxh_ref, bhh_ref,
                    h_ref, o_ref):
    """Fused ConvGRU cell: both gate convolutions + gate math, lane dim = N*H*W."""
    cx = colsx_ref[...]
    ch = colsh_ref[...]
    z = jax.nn.sigmoid(
        jnp.dot(wxz_ref[...], cx, preferred_element_type=jnp.float32)
        + jnp.dot(whz_ref[...], ch, preferred_element_type=jnp.float32)
        + bz_ref[...])
    r = jax.nn.sigmoid(
        jnp.dot(wxr_ref[...], cx, preferred_element_type=jnp.float32)
        + jnp.dot(whr_ref[...], ch, preferred_element_type=jnp.float32)
        + br_ref[...])
    xh = jnp.dot(wxh_ref[...], cx, preferred_element_type=jnp.float32) + bxh_ref[...]
    hh = jnp.dot(whh_ref[...], ch, preferred_element_type=jnp.float32) + bhh_ref[...]
    ht = xh + r * hh
    ht = jnp.where(ht >= 0.0, ht, 0.2 * ht)       # LeakyReLU(0.2) candidate state
    o_ref[...] = (1.0 - z) * ht + z * h_ref[...]


# --------------------------------------------------------------------------- #
# Conv / deconv / GRU built on the Pallas kernels.  Internal layout is CNHW
# (channel, batch, height, width) so the (Cout, N*Ho*Wo) matmul output maps
# straight back to the activation tensor without a transpose.
# --------------------------------------------------------------------------- #
def _im2col_cnhw(x, K, stride, pad):
    """x: (C, N, H, W) -> cols (C*K*K, N*Ho*Wo), rows ordered (c, ki, kj)."""
    C, N, H, W = x.shape
    xp = jnp.pad(x, ((0, 0), (0, 0), (pad, pad), (pad, pad)))
    Ho = (H + 2 * pad - K) // stride + 1
    Wo = (W + 2 * pad - K) // stride + 1
    patches = []
    for ki in range(K):
        for kj in range(K):
            patches.append(xp[:, :, ki:ki + stride * Ho:stride, kj:kj + stride * Wo:stride])
    cols = jnp.stack(patches, axis=1)                 # (C, K*K, N, Ho, Wo)
    cols = cols.reshape(C * K * K, N * Ho * Wo)
    return cols, Ho, Wo


def conv2d_cnhw(x, w, b, stride, pad, act=None):
    """x: (C,N,H,W); w: (Cout,Cin,K,K); b: (Cout,). Returns (Cout,N,Ho,Wo)."""
    C, N, H, W = x.shape
    Cout, Cin, K, _ = w.shape
    assert Cin == C
    cols, Ho, Wo = _im2col_cnhw(x, K, stride, pad)
    wmat = w.reshape(Cout, Cin * K * K)
    out = pallas_matmul_bias(wmat, cols, b.reshape(Cout, 1), act=act)   # (Cout, N*Ho*Wo)
    return out.reshape(Cout, N, Ho, Wo)


def deconv2d_cnhw(x, w, b, stride, pad, act=None):
    """ConvTranspose2d.  w: PyTorch layout (Cin, Cout, K, K).  x: CNHW."""
    # TODO(synk): replace zero-insertion with sub-pixel (stride^2 conv) decomposition.
    C, N, H, W = x.shape
    Cin, Cout, K, _ = w.shape
    assert Cin == C
    if stride > 1:
        xd = jnp.zeros((C, N, (H - 1) * stride + 1, (W - 1) * stride + 1), x.dtype)
        xd = xd.at[:, :, ::stride, ::stride].set(x)
    else:
        xd = x
    w_conv = jnp.flip(w, axis=(2, 3)).transpose(1, 0, 2, 3)   # (Cout, Cin, K, K)
    return conv2d_cnhw(xd, w_conv, b, 1, K - 1 - pad, act=act)


def convgru_cell(x, h, gp, k, pad):
    """x: (Cx,N,H,W) input, h: (C,N,H,W) state -> new state (C,N,H,W)."""
    C, N, H, W = h.shape
    Cx = x.shape[0]
    colsx, Ho, Wo = _im2col_cnhw(x, k, 1, pad)
    colsh, _, _ = _im2col_cnhw(h, k, 1, pad)
    M = N * Ho * Wo
    wx = gp["xw"].reshape(3 * C, Cx * k * k)
    wh = gp["hw"].reshape(3 * C, C * k * k)
    bx = gp["xb"].reshape(3 * C, 1)
    bh = gp["hb"].reshape(3 * C, 1)
    wxz, wxr, wxh = wx[:C], wx[C:2 * C], wx[2 * C:]
    whz, whr, whh = wh[:C], wh[C:2 * C], wh[2 * C:]
    bz = (bx[:C] + bh[:C]).astype(jnp.float32)
    br = (bx[C:2 * C] + bh[C:2 * C]).astype(jnp.float32)
    bxh = bx[2 * C:].astype(jnp.float32)
    bhh = bh[2 * C:].astype(jnp.float32)
    out = pl.pallas_call(
        _convgru_kernel,
        out_shape=jax.ShapeDtypeStruct((C, M), jnp.float32),
    )(colsx.astype(jnp.bfloat16), colsh.astype(jnp.bfloat16),
      wxz.astype(jnp.bfloat16), wxr.astype(jnp.bfloat16), wxh.astype(jnp.bfloat16),
      whz.astype(jnp.bfloat16), whr.astype(jnp.bfloat16), whh.astype(jnp.bfloat16),
      bz, br, bxh, bhh, h.reshape(C, M).astype(jnp.float32))
    return out.reshape(C, N, Ho, Wo)


# --------------------------------------------------------------------------- #
# Model configuration (small synthetic shapes)
# --------------------------------------------------------------------------- #
B = 2
N_ENCODERS = 2
N_FORECASTERS = 2

ENC_IN_C = 1
ENC_DOWN_C = [4, 8]
ENC_GRU_C = [4, 8]
ENC_DOWN_K = [3, 3]
ENC_DOWN_S = [2, 2]
ENC_DOWN_P = [1, 1]
ENC_GRU_K = [3, 3]
ENC_GRU_S = [1, 1]
ENC_GRU_P = [1, 1]
ENC_N_LAYERS = 2

FC_UP_CIN = [8, 4]          # = reversed encoder gru channels
FC_UP_COUT = [8, 4]
FC_UP_K = [4, 4]
FC_UP_S = [2, 2]
FC_UP_P = [1, 1]
FC_N_LAYERS = 2
FC_OUT_COUT = [1]
FC_OUT_K = [1]
FC_OUT_S = [1]
FC_OUT_P = [0]
FC_N_OUT_LAYERS = 1

TY_INPUT = 6
TY_HIDDEN = [16, 6]         # final layer must emit 6 (-> view(-1, 2, 3))
TY_N_LAYERS = 2
X_ILOC = (8, 24)
Y_ILOC = (8, 24)

H_IN, W_IN = 16, 16         # encoder input spatial
H_MAP, W_MAP = 32, 32       # radar_map spatial


# --------------------------------------------------------------------------- #
# Deterministic parameter init
# --------------------------------------------------------------------------- #
def init_params(key):
    p = {"encoder": {"down": [], "gru": []}, "forecaster": {"up": [], "out": []},
         "tycatcher": {"W": [], "b": []}}

    def conv_init(k, cout, cin, ksz):
        std = 1.0 / jnp.sqrt(float(cin * ksz * ksz))
        return jax.random.normal(k, (cout, cin, ksz, ksz), jnp.float32) * std

    keys = jax.random.split(key, 64)
    ki = 0

    # Encoder
    for i in range(ENC_N_LAYERS):
        cin = ENC_IN_C if i == 0 else ENC_GRU_C[i - 1]
        p["encoder"]["down"].append({
            "w": conv_init(keys[ki], ENC_DOWN_C[i], cin, ENC_DOWN_K[i]),
            "b": jnp.zeros((ENC_DOWN_C[i],), jnp.float32)})
        ki += 1
        p["encoder"]["gru"].append({
            "xw": conv_init(keys[ki], 3 * ENC_GRU_C[i], ENC_DOWN_C[i], ENC_GRU_K[i]),
            "xb": jnp.zeros((3 * ENC_GRU_C[i],), jnp.float32),
            "hw": conv_init(keys[ki + 1], 3 * ENC_GRU_C[i], ENC_GRU_C[i], ENC_GRU_K[i]),
            "hb": jnp.zeros((3 * ENC_GRU_C[i],), jnp.float32)})
        ki += 2

    # Forecaster (deconv weights in PyTorch ConvTranspose layout (Cin, Cout, K, K))
    for i in range(FC_N_LAYERS):
        cin = FC_UP_CIN[i] if i == 0 else FC_UP_CIN[i] + FC_UP_COUT[i - 1]
        std = 1.0 / jnp.sqrt(float(cin * FC_UP_K[i] * FC_UP_K[i]))
        w = jax.random.normal(keys[ki], (cin, FC_UP_COUT[i], FC_UP_K[i], FC_UP_K[i]),
                              jnp.float32) * std
        p["forecaster"]["up"].append({"w": w, "b": jnp.zeros((FC_UP_COUT[i],), jnp.float32)})
        ki += 1
    for i in range(FC_N_OUT_LAYERS):
        cin = FC_UP_COUT[-1] if i == 0 else FC_OUT_COUT[i - 1]
        p["forecaster"]["out"].append({
            "w": conv_init(keys[ki], FC_OUT_COUT[i], cin, FC_OUT_K[i]),
            "b": jnp.zeros((FC_OUT_COUT[i],), jnp.float32)})
        ki += 1

    # TyCatcher (kaiming normal weights, zero bias — matches reference init)
    for i in range(TY_N_LAYERS):
        fan_in = TY_INPUT if i == 0 else TY_HIDDEN[i - 1]
        std = jnp.sqrt(2.0 / float(fan_in))
        W = jax.random.normal(keys[ki], (TY_HIDDEN[i], fan_in), jnp.float32) * std
        p["tycatcher"]["W"].append(W)
        p["tycatcher"]["b"].append(jnp.zeros((TY_HIDDEN[i],), jnp.float32))
        ki += 1
    return p


# --------------------------------------------------------------------------- #
# Sub-module forwards (all activations flow in CNHW layout)
# --------------------------------------------------------------------------- #
def encoder_forward(x, hidden, ep):
    if hidden is None:
        hidden = [None] * ENC_N_LAYERS
    inp = x
    upd = []
    for i in range(ENC_N_LAYERS):
        inp = conv2d_cnhw(inp, ep["down"][i]["w"], ep["down"][i]["b"],
                          ENC_DOWN_S[i], ENC_DOWN_P[i], act="lrelu")
        h = hidden[i]
        if h is None:
            h = jnp.zeros((ENC_GRU_C[i], inp.shape[1], inp.shape[2], inp.shape[3]),
                          jnp.float32)
        h_new = convgru_cell(inp, h, ep["gru"][i], ENC_GRU_K[i], ENC_GRU_P[i])
        upd.append(h_new)
        inp = h_new
    return upd


def forecaster_forward(hidden_rev, fp):
    out = None
    for i in range(FC_N_LAYERS):
        inp = hidden_rev[i]
        if i != 0:
            inp = jnp.concatenate([inp, out], axis=0)     # channel concat in CNHW
        out = deconv2d_cnhw(inp, fp["up"][i]["w"], fp["up"][i]["b"],
                            FC_UP_S[i], FC_UP_P[i], act="lrelu")
    for i in range(FC_N_OUT_LAYERS):
        last = (i == FC_N_OUT_LAYERS - 1)
        # dBZ -> rain-rate transform fused into the final conv's epilogue.
        out = conv2d_cnhw(out, fp["out"][i]["w"], fp["out"][i]["b"],
                          FC_OUT_S[i], FC_OUT_P[i],
                          act="lrelu_dbz" if last else "lrelu")
    return out


def affine_grid(theta, size):
    """F.affine_grid, align_corners=False.  theta: (B,2,3) -> grid (B,H,W,2) as (x,y)."""
    Bsz, _, H, W = size
    xs = (jnp.arange(W, dtype=jnp.float32) + 0.5) * 2.0 / W - 1.0
    ys = (jnp.arange(H, dtype=jnp.float32) + 0.5) * 2.0 / H - 1.0
    gx, gy = jnp.meshgrid(xs, ys)                      # (H, W)
    base = jnp.stack([gx, gy, jnp.ones_like(gx)], -1)  # (H, W, 3)
    return jnp.einsum("hwk,bnk->bhwn", base, theta)    # (B, H, W, 2)


def grid_sample_bilinear(img, grid):
    """F.grid_sample, bilinear, zeros padding, align_corners=False (NCHW)."""
    # TODO(synk): data-dependent gather kept in plain JAX (no clean Pallas tiling).
    Bsz, C, H, W = img.shape
    gx, gy = grid[..., 0], grid[..., 1]
    ix = ((gx + 1.0) * W - 1.0) / 2.0
    iy = ((gy + 1.0) * H - 1.0) / 2.0
    x0 = jnp.floor(ix); y0 = jnp.floor(iy)
    x1 = x0 + 1.0; y1 = y0 + 1.0
    wx1 = ix - x0; wx0 = 1.0 - wx1
    wy1 = iy - y0; wy0 = 1.0 - wy1
    flat = img.reshape(Bsz, C, H * W)

    def gather(xi, yi):
        valid = (xi >= 0) & (xi < W) & (yi >= 0) & (yi < H)
        xc = jnp.clip(xi, 0, W - 1).astype(jnp.int32)
        yc = jnp.clip(yi, 0, H - 1).astype(jnp.int32)
        idx = (yc * W + xc).reshape(Bsz, 1, -1)
        vals = jnp.take_along_axis(flat, jnp.broadcast_to(idx, (Bsz, C, idx.shape[-1])), axis=2)
        vals = vals.reshape(Bsz, C, xi.shape[1], xi.shape[2])
        return vals * valid[:, None, :, :].astype(img.dtype)

    out = (gather(x0, y0) * (wx0 * wy0)[:, None] + gather(x1, y0) * (wx1 * wy0)[:, None]
           + gather(x0, y1) * (wx0 * wy1)[:, None] + gather(x1, y1) * (wx1 * wy1)[:, None])
    return out


def tycatcher_forward(ty_info, radar_map, tp):
    # Tiny MLP (M=2 rows) deliberately left in XLA: a Pallas launch here is pure overhead.
    out = ty_info
    for i in range(TY_N_LAYERS):
        out = out @ tp["W"][i].T + tp["b"][i][None, :]
    out = out.reshape(-1, 2, 3)
    o1, o2 = out[:, :, :2], out[:, :, 2:3]
    bsz = radar_map.shape[0]
    theta1 = jnp.broadcast_to(jnp.eye(2, dtype=jnp.float32)[None], (bsz, 2, 2))
    theta2 = jnp.zeros((bsz, 2, 1), jnp.float32)
    theta = jnp.concatenate([theta1 + 0.1 * o1, theta2 + o2], axis=2)
    grid = affine_grid(theta, radar_map.shape)
    sample = grid_sample_bilinear(radar_map, grid)
    sample = sample[:, :, Y_ILOC[0]:Y_ILOC[1], X_ILOC[0]:X_ILOC[1]]
    return sample, theta


def model_forward(encoder_inputs, ty_infos, radar_map, params):
    # TODO(synk): the per-timestep Python loops could be folded into a single
    #             pallas_call with a time grid axis + VMEM-carried hidden state.
    hidden = None
    for i in range(N_ENCODERS):
        x = jnp.transpose(encoder_inputs[:, i], (1, 0, 2, 3))   # NCHW -> CNHW
        hidden = encoder_forward(x, hidden, params["encoder"])
    forecasts = []
    for i in range(N_FORECASTERS):
        sample, _ = tycatcher_forward(ty_infos[:, i, :], radar_map, params["tycatcher"])
        sample = jnp.transpose(sample, (1, 0, 2, 3))            # NCHW -> CNHW
        hidden = encoder_forward(sample, hidden, params["encoder"])
        out = forecaster_forward(hidden[::-1], params["forecaster"])   # (1, N, H, W)
        forecasts.append(out)
    forecast = jnp.concatenate(forecasts, axis=0)               # (T, N, H, W)
    # dBZ -> rain transform already applied inside the final conv kernel.
    return jnp.transpose(forecast, (1, 0, 2, 3))                # NCHW output


# --------------------------------------------------------------------------- #
if __name__ == "__main__":
    key = jax.random.PRNGKey(0)
    kp, k1, k2, k3 = jax.random.split(key, 4)
    params = init_params(kp)

    encoder_inputs = jax.random.normal(k1, (B, N_ENCODERS, ENC_IN_C, H_IN, W_IN), jnp.float32)
    ty_infos = jax.random.normal(k2, (B, N_FORECASTERS, TY_INPUT), jnp.float32)
    radar_map = jax.random.normal(k3, (B, 1, H_MAP, W_MAP), jnp.float32)

    fwd = jax.jit(model_forward)
    out = fwd(encoder_inputs, ty_infos, radar_map, params)
    out = jax.block_until_ready(out)
    assert out.shape == (B, N_FORECASTERS, H_IN, W_IN), out.shape
    assert jnp.all(jnp.isfinite(out))
    print("KERNEL_OK")
</pallas_src>

<mosaic_0001>
module attributes {stable_mosaic.version = 11 : i64} {
  func.func private @main(%arg0: i32) attributes {dimension_semantics = [#tpu.dimension_semantics<core_parallel>], iteration_bounds = array<i64: 2>, tpu.core_type = #tpu.core_type<sc_scalar_subcore>, window_params = []} {
    return
  }
}

module attributes {stable_mosaic.version = 11 : i64} {
  func.func private @main(%arg0: i32) attributes {dimension_semantics = [#tpu.dimension_semantics<core_parallel>], iteration_bounds = array<i64: 2>, tpu.core_type = #tpu.core_type<sc_scalar_subcore>, window_params = []} {
    return
  }
}

module attributes {stable_mosaic.version = 11 : i64} {
  func.func @_mm_bias_kernel(%arg0: i32, %arg1: memref<4x9xbf16, #tpu.memory_space<vmem>>, %arg2: memref<9x128xbf16, #tpu.memory_space<vmem>>, %arg3: memref<4x1xf32, #tpu.memory_space<vmem>>, %arg4: memref<4x128xf32, #tpu.memory_space<vmem>>) attributes {dimension_semantics = [#tpu.dimension_semantics<parallel>], iteration_bounds = array<i64: 1>, scalar_prefetch = 0 : i64, scratch_operands = 0 : i64, tpu.core_type = #tpu.core_type<tc>, window_params = [{pipeline_mode = #tpu.pipeline_mode<synchronous>, transform_indices = @transform_0, window_bounds = array<i64: 4, 9>}, {transform_indices = @transform_1, window_bounds = array<i64: 9, 128>}, {pipeline_mode = #tpu.pipeline_mode<synchronous>, transform_indices = @transform_2, window_bounds = array<i64: 4, 1>}, {transform_indices = @transform_3, window_bounds = array<i64: 4, 128>}]} {
    %c0 = arith.constant 0 : index
    %c0_0 = arith.constant 0 : index
    %0 = vector.load %arg1[%c0, %c0_0] : memref<4x9xbf16, #tpu.memory_space<vmem>>, vector<4x9xbf16>
    %c0_1 = arith.constant 0 : index
    %c0_2 = arith.constant 0 : index
    %1 = vector.load %arg2[%c0_1, %c0_2] : memref<9x128xbf16, #tpu.memory_space<vmem>>, vector<9x128xbf16>
    %cst = arith.constant dense<0.000000e+00> : vector<4x128xf32>
    %2 = tpu.matmul %0, %1, %cst {dimension_numbers = #tpu.dot_dimension_numbers<[1], [0], [0], [1], [0, 0, 1, 1], [], []>} : vector<4x9xbf16>, vector<9x128xbf16>, vector<4x128xf32> -> vector<4x128xf32>
    %c0_3 = arith.constant 0 : index
    %c0_4 = arith.constant 0 : index
    %3 = vector.load %arg3[%c0_3, %c0_4] : memref<4x1xf32, #tpu.memory_space<vmem>>, vector<4x1xf32>
    %4 = vector.broadcast %3 : vector<4x1xf32> to vector<4x128xf32>
    %5 = arith.addf %2, %4 : vector<4x128xf32>
    %cst_5 = arith.constant 0.000000e+00 : f32
    %6 = vector.broadcast %cst_5 : f32 to vector<4x128xf32>
    %7 = arith.cmpf oge, %5, %6 : vector<4x128xf32>
    %cst_6 = arith.constant 2.000000e-01 : f32
    %8 = vector.broadcast %cst_6 : f32 to vector<4x128xf32>
    %9 = arith.mulf %8, %5 : vector<4x128xf32>
    %10 = arith.select %7, %5, %9 : vector<4x128xi1>, vector<4x128xf32>
    %c0_7 = arith.constant 0 : index
    %c0_8 = arith.constant 0 : index
    %11 = vector.load %arg4[%c0_7, %c0_8] : memref<4x128xf32, #tpu.memory_space<vmem>>, vector<4x128xf32>
    tpu.vector_store %arg4[%c0_7, %c0_8], %10 {strides = array<i32>} : memref<4x128xf32, #tpu.memory_space<vmem>>, vector<4x128xf32>,
    return
  }
  func.func @transform_0(%arg0: i32) -> (i32, i32) {
    %c0_i32 = arith.constant 0 : i32
    %c0_i32_0 = arith.constant 0 : i32
    %c0_i32_1 = arith.constant 0 : i32
    return %c0_i32, %c0_i32_0 : i32, i32
  }
  func.func @transform_1(%arg0: i32) -> (i32, i32) {
    %c0_i32 = arith.constant 0 : i32
    %c0_i32_0 = arith.constant 0 : i32
    return %c0_i32, %arg0 : i32, i32
  }
  func.func @transform_2(%arg0: i32) -> (i32, i32) {
    %c0_i32 = arith.constant 0 : i32
    %c0_i32_0 = arith.constant 0 : i32
    %c0_i32_1 = arith.constant 0 : i32
    return %c0_i32, %c0_i32_0 : i32, i32
  }
  func.func @transform_3(%arg0: i32) -> (i32, i32) {
    %c0_i32 = arith.constant 0 : i32
    %c0_i32_0 = arith.constant 0 : i32
    return %c0_i32, %arg0 : i32, i32
  }
}

module attributes {stable_mosaic.version = 11 : i64} {
  func.func @_convgru_kernel(%arg0: memref<36x128xbf16, #tpu.memory_space<vmem>>, %arg1: memref<36x128xbf16, #tpu.memory_space<vmem>>, %arg2: memref<4x36xbf16, #tpu.memory_space<vmem>>, %arg3: memref<4x36xbf16, #tpu.memory_space<vmem>>, %arg4: memref<4x36xbf16, #tpu.memory_space<vmem>>, %arg5: memref<4x36xbf16, #tpu.memory_space<vmem>>, %arg6: memref<4x36xbf16, #tpu.memory_space<vmem>>, %arg7: memref<4x36xbf16, #tpu.memory_space<vmem>>, %arg8: memref<4x1xf32, #tpu.memory_space<vmem>>, %arg9: memref<4x1xf32, #tpu.memory_space<vmem>>, %arg10: memref<4x1xf32, #tpu.memory_space<vmem>>, %arg11: memref<4x1xf32, #tpu.memory_space<vmem>>, %arg12: memref<4x128xf32, #tpu.memory_space<vmem>>, %arg13: memref<4x128xf32, #tpu.memory_space<vmem>>) attributes {dimension_semantics = [], scalar_prefetch = 0 : i64, scratch_operands = 0 : i64, tpu.core_type = #tpu.core_type<tc>} {
    %c0 = arith.constant 0 : index
    %c0_0 = arith.constant 0 : index
    %0 = vector.load %arg0[%c0, %c0_0] : memref<36x128xbf16, #tpu.memory_space<vmem>>, vector<36x128xbf16>
    %c0_1 = arith.constant 0 : index
    %c0_2 = arith.constant 0 : index
    %1 = vector.load %arg1[%c0_1, %c0_2] : memref<36x128xbf16, #tpu.memory_space<vmem>>, vector<36x128xbf16>
    %c0_3 = arith.constant 0 : index
    %c0_4 = arith.constant 0 : index
    %2 = vector.load %arg2[%c0_3, %c0_4] : memref<4x36xbf16, #tpu.memory_space<vmem>>, vector<4x36xbf16>
    %cst = arith.constant dense<0.000000e+00> : vector<4x128xf32>
    %3 = tpu.matmul %2, %0, %cst {dimension_numbers = #tpu.dot_dimension_numbers<[1], [0], [0], [1], [0, 0, 1, 1], [], []>} : vector<4x36xbf16>, vector<36x128xbf16>, vector<4x128xf32> -> vector<4x128xf32>
    %c0_5 = arith.constant 0 : index
    %c0_6 = arith.constant 0 : index
    %4 = vector.load %arg5[%c0_5, %c0_6] : memref<4x36xbf16, #tpu.memory_space<vmem>>, vector<4x36xbf16>
    %cst_7 = arith.constant dense<0.000000e+00> : vector<4x128xf32>
    %5 = tpu.matmul %4, %1, %cst_7 {dimension_numbers = #tpu.dot_dimension_numbers<[1], [0], [0], [1], [0, 0, 1, 1], [], []>} : vector<4x36xbf16>, vector<36x128xbf16>, vector<4x128xf32> -> vector<4x128xf32>
    %6 = arith.addf %3, %5 : vector<4x128xf32>
    %c0_8 = arith.constant 0 : index
    %c0_9 = arith.constant 0 : index
    %7 = vector.load %arg8[%c0_8, %c0_9] : memref<4x1xf32, #tpu.memory_space<vmem>>, vector<4x1xf32>
    %8 = vector.broadcast %7 : vector<4x1xf32> to vector<4x128xf32>
    %9 = arith.addf %6, %8 : vector<4x128xf32>
    %10 = arith.negf %9 : vector<4x128xf32>
    %11 = math.exp %10 : vector<4x128xf32>
    %cst_10 = arith.constant 1.000000e+00 : f32
    %12 = vector.broadcast %cst_10 : f32 to vector<4x128xf32>
    %13 = arith.addf %12, %11 : vector<4x128xf32>
    %14 = arith.divf %12, %13 : vector<4x128xf32>
    %c0_11 = arith.constant 0 : index
    %c0_12 = arith.constant 0 : index
    %15 = vector.load %arg3[%c0_11, %c0_12] : memref<4x36xbf16, #tpu.memory_space<vmem>>, vector<4x36xbf16>
    %cst_13 = arith.constant dense<0.000000e+00> : vector<4x128xf32>
    %16 = tpu.matmul %15, %0, %cst_13 {dimension_numbers = #tpu.dot_dimension_numbers<[1], [0], [0], [1], [0, 0, 1, 1], [], []>} : vector<4x36xbf16>, vector<36x128xbf16>, vector<4x128xf32> -> vector<4x128xf32>
    %c0_14 = arith.constant 0 : index
    %c0_15 = arith.constant 0 : index
    %17 = vector.load %arg6[%c0_14, %c0_15] : memref<4x36xbf16, #tpu.memory_space<vmem>>, vector<4x36xbf16>
    %cst_16 = arith.constant dense<0.000000e+00> : vector<4x128xf32>
    %18 = tpu.matmul %17, %1, %cst_16 {dimension_numbers = #tpu.dot_dimension_numbers<[1], [0], [0], [1], [0, 0, 1, 1], [], []>} : vector<4x36xbf16>, vector<36x128xbf16>, vector<4x128xf32> -> vector<4x128xf32>
    %19 = arith.addf %16, %18 : vector<4x128xf32>
    %c0_17 = arith.constant 0 : index
    %c0_18 = arith.constant 0 : index
    %20 = vector.load %arg9[%c0_17, %c0_18] : memref<4x1xf32, #tpu.memory_space<vmem>>, vector<4x1xf32>
    %21 = vector.broadcast %20 : vector<4x1xf32> to vector<4x128xf32>
    %22 = arith.addf %19, %21 : vector<4x128xf32>
    %23 = arith.negf %22 : vector<4x128xf32>
    %24 = math.exp %23 : vector<4x128xf32>
    %cst_19 = arith.constant 1.000000e+00 : f32
    %25 = vector.broadcast %cst_19 : f32 to vector<4x128xf32>
    %26 = arith.addf %25, %24 : vector<4x128xf32>
    %27 = arith.divf %25, %26 : vector<4x128xf32>
    %c0_20 = arith.constant 0 : index
    %c0_21 = arith.constant 0 : index
    %28 = vector.load %arg4[%c0_20, %c0_21] : memref<4x36xbf16, #tpu.memory_space<vmem>>, vector<4x36xbf16>
    %cst_22 = arith.constant dense<0.000000e+00> : vector<4x128xf32>
    %29 = tpu.matmul %28, %0, %cst_22 {dimension_numbers = #tpu.dot_dimension_numbers<[1], [0], [0], [1], [0, 0, 1, 1], [], []>} : vector<4x36xbf16>, vector<36x128xbf16>, vector<4x128xf32> -> vector<4x128xf32>
    %c0_23 = arith.constant 0 : index
    %c0_24 = arith.constant 0 : index
    %30 = vector.load %arg10[%c0_23, %c0_24] : memref<4x1xf32, #tpu.memory_space<vmem>>, vector<4x1xf32>
    %31 = vector.broadcast %30 : vector<4x1xf32> to vector<4x128xf32>
    %32 = arith.addf %29, %31 : vector<4x128xf32>
    %c0_25 = arith.constant 0 : index
    %c0_26 = arith.constant 0 : index
    %33 = vector.load %arg7[%c0_25, %c0_26] : memref<4x36xbf16, #tpu.memory_space<vmem>>, vector<4x36xbf16>
    %cst_27 = arith.constant dense<0.000000e+00> : vector<4x128xf32>
    %34 = tpu.matmul %33, %1, %cst_27 {dimension_numbers = #tpu.dot_dimension_numbers<[1], [0], [0], [1], [0, 0, 1, 1], [], []>} : vector<4x36xbf16>, vector<36x128xbf16>, vector<4x128xf32> -> vector<4x128xf32>
    %c0_28 = arith.constant 0 : index
    %c0_29 = arith.constant 0 : index
    %35 = vector.load %arg11[%c0_28, %c0_29] : memref<4x1xf32, #tpu.memory_space<vmem>>, vector<4x1xf32>
    %36 = vector.broadcast %35 : vector<4x1xf32> to vector<4x128xf32>
    %37 = arith.addf %34, %36 : vector<4x128xf32>
    %38 = arith.mulf %27, %37 : vector<4x128xf32>
    %39 = arith.addf %32, %38 : vector<4x128xf32>
    %cst_30 = arith.constant 0.000000e+00 : f32
    %40 = vector.broadcast %cst_30 : f32 to vector<4x128xf32>
    %41 = arith.cmpf oge, %39, %40 : vector<4x128xf32>
    %cst_31 = arith.constant 2.000000e-01 : f32
    %42 = vector.broadcast %cst_31 : f32 to vector<4x128xf32>
    %43 = arith.mulf %42, %39 : vector<4x128xf32>
    %44 = arith.select %41, %39, %43 : vector<4x128xi1>, vector<4x128xf32>
    %cst_32 = arith.constant 1.000000e+00 : f32
    %45 = vector.broadcast %cst_32 : f32 to vector<4x128xf32>
    %46 = arith.subf %45, %14 : vector<4x128xf32>
    %47 = arith.mulf %46, %44 : vector<4x128xf32>
    %c0_33 = arith.constant 0 : index
    %c0_34 = arith.constant 0 : index
    %48 = vector.load %arg12[%c0_33, %c0_34] : memref<4x128xf32, #tpu.memory_space<vmem>>, vector<4x128xf32>
    %49 = arith.mulf %14, %48 : vector<4x128xf32>
    %50 = arith.addf %47, %49 : vector<4x128xf32>
    %c0_35 = arith.constant 0 : index
    %c0_36 = arith.constant 0 : index
    %51 = vector.load %arg13[%c0_35, %c0_36] : memref<4x128xf32, #tpu.memory_space<vmem>>, vector<4x128xf32>
    tpu.vector_store %arg13[%c0_35, %c0_36], %50 {strides = array<i32>} : memref<4x128xf32, #tpu.memory_space<vmem>>, vector<4x128xf32>,
    return
  }
}

module attributes {stable_mosaic.version = 11 : i64} {
  func.func @_mm_bias_kernel(%arg0: i32, %arg1: memref<8x36xbf16, #tpu.memory_space<vmem>>, %arg2: memref<36x32xbf16, #tpu.memory_space<vmem>>, %arg3: memref<8x1xf32, #tpu.memory_space<vmem>>, %arg4: memref<8x32xf32, #tpu.memory_space<vmem>>) attributes {dimension_semantics = [#tpu.dimension_semantics<parallel>], iteration_bounds = array<i64: 1>, scalar_prefetch = 0 : i64, scratch_operands = 0 : i64, tpu.core_type = #tpu.core_type<tc>, window_params = [{pipeline_mode = #tpu.pipeline_mode<synchronous>, transform_indices = @transform_0, window_bounds = array<i64: 8, 36>}, {transform_indices = @transform_1, window_bounds = array<i64: 36, 32>}, {pipeline_mode = #tpu.pipeline_mode<synchronous>, transform_indices = @transform_2, window_bounds = array<i64: 8, 1>}, {transform_indices = @transform_3, window_bounds = array<i64: 8, 32>}]} {
    %c0 = arith.constant 0 : index
    %c0_0 = arith.constant 0 : index
    %0 = vector.load %arg1[%c0, %c0_0] : memref<8x36xbf16, #tpu.memory_space<vmem>>, vector<8x36xbf16>
    %c0_1 = arith.constant 0 : index
    %c0_2 = arith.constant 0 : index
    %1 = vector.load %arg2[%c0_1, %c0_2] : memref<36x32xbf16, #tpu.memory_space<vmem>>, vector<36x32xbf16>
    %cst = arith.constant dense<0.000000e+00> : vector<8x32xf32>
    %2 = tpu.matmul %0, %1, %cst {dimension_numbers = #tpu.dot_dimension_numbers<[1], [0], [0], [1], [0, 0, 1, 1], [], []>} : vector<8x36xbf16>, vector<36x32xbf16>, vector<8x32xf32> -> vector<8x32xf32>
    %c0_3 = arith.constant 0 : index
    %c0_4 = arith.constant 0 : index
    %3 = vector.load %arg3[%c0_3, %c0_4] : memref<8x1xf32, #tpu.memory_space<vmem>>, vector<8x1xf32>
    %4 = vector.broadcast %3 : vector<8x1xf32> to vector<8x32xf32>
    %5 = arith.addf %2, %4 : vector<8x32xf32>
    %cst_5 = arith.constant 0.000000e+00 : f32
    %6 = vector.broadcast %cst_5 : f32 to vector<8x32xf32>
    %7 = arith.cmpf oge, %5, %6 : vector<8x32xf32>
    %cst_6 = arith.constant 2.000000e-01 : f32
    %8 = vector.broadcast %cst_6 : f32 to vector<8x32xf32>
    %9 = arith.mulf %8, %5 : vector<8x32xf32>
    %10 = arith.select %7, %5, %9 : vector<8x32xi1>, vector<8x32xf32>
    %c0_7 = arith.constant 0 : index
    %c0_8 = arith.constant 0 : index
    %11 = vector.load %arg4[%c0_7, %c0_8] : memref<8x32xf32, #tpu.memory_space<vmem>>, vector<8x32xf32>
    tpu.vector_store %arg4[%c0_7, %c0_8], %10 {strides = array<i32>} : memref<8x32xf32, #tpu.memory_space<vmem>>, vector<8x32xf32>,
    return
  }
  func.func @transform_0(%arg0: i32) -> (i32, i32) {
    %c0_i32 = arith.constant 0 : i32
    %c0_i32_0 = arith.constant 0 : i32
    %c0_i32_1 = arith.constant 0 : i32
    return %c0_i32, %c0_i32_0 : i32, i32
  }
  func.func @transform_1(%arg0: i32) -> (i32, i32) {
    %c0_i32 = arith.constant 0 : i32
    %c0_i32_0 = arith.constant 0 : i32
    return %c0_i32, %arg0 : i32, i32
  }
  func.func @transform_2(%arg0: i32) -> (i32, i32) {
    %c0_i32 = arith.constant 0 : i32
    %c0_i32_0 = arith.constant 0 : i32
    %c0_i32_1 = arith.constant 0 : i32
    return %c0_i32, %c0_i32_0 : i32, i32
  }
  func.func @transform_3(%arg0: i32) -> (i32, i32) {
    %c0_i32 = arith.constant 0 : i32
    %c0_i32_0 = arith.constant 0 : i32
    return %c0_i32, %arg0 : i32, i32
  }
}

module attributes {stable_mosaic.version = 11 : i64} {
  func.func @_convgru_kernel(%arg0: memref<72x32xbf16, #tpu.memory_space<vmem>>, %arg1: memref<72x32xbf16, #tpu.memory_space<vmem>>, %arg2: memref<8x72xbf16, #tpu.memory_space<vmem>>, %arg3: memref<8x72xbf16, #tpu.memory_space<vmem>>, %arg4: memref<8x72xbf16, #tpu.memory_space<vmem>>, %arg5: memref<8x72xbf16, #tpu.memory_space<vmem>>, %arg6: memref<8x72xbf16, #tpu.memory_space<vmem>>, %arg7: memref<8x72xbf16, #tpu.memory_space<vmem>>, %arg8: memref<8x1xf32, #tpu.memory_space<vmem>>, %arg9: memref<8x1xf32, #tpu.memory_space<vmem>>, %arg10: memref<8x1xf32, #tpu.memory_space<vmem>>, %arg11: memref<8x1xf32, #tpu.memory_space<vmem>>, %arg12: memref<8x32xf32, #tpu.memory_space<vmem>>, %arg13: memref<8x32xf32, #tpu.memory_space<vmem>>) attributes {dimension_semantics = [], scalar_prefetch = 0 : i64, scratch_operands = 0 : i64, tpu.core_type = #tpu.core_type<tc>} {
    %c0 = arith.constant 0 : index
    %c0_0 = arith.constant 0 : index
    %0 = vector.load %arg0[%c0, %c0_0] : memref<72x32xbf16, #tpu.memory_space<vmem>>, vector<72x32xbf16>
    %c0_1 = arith.constant 0 : index
    %c0_2 = arith.constant 0 : index
    %1 = vector.load %arg1[%c0_1, %c0_2] : memref<72x32xbf16, #tpu.memory_space<vmem>>, vector<72x32xbf16>
    %c0_3 = arith.constant 0 : index
    %c0_4 = arith.constant 0 : index
    %2 = vector.load %arg2[%c0_3, %c0_4] : memref<8x72xbf16, #tpu.memory_space<vmem>>, vector<8x72xbf16>
    %cst = arith.constant dense<0.000000e+00> : vector<8x32xf32>
    %3 = tpu.matmul %2, %0, %cst {dimension_numbers = #tpu.dot_dimension_numbers<[1], [0], [0], [1], [0, 0, 1, 1], [], []>} : vector<8x72xbf16>, vector<72x32xbf16>, vector<8x32xf32> -> vector<8x32xf32>
    %c0_5 = arith.constant 0 : index
    %c0_6 = arith.constant 0 : index
    %4 = vector.load %arg5[%c0_5, %c0_6] : memref<8x72xbf16, #tpu.memory_space<vmem>>, vector<8x72xbf16>
    %cst_7 = arith.constant dense<0.000000e+00> : vector<8x32xf32>
    %5 = tpu.matmul %4, %1, %cst_7 {dimension_numbers = #tpu.dot_dimension_numbers<[1], [0], [0], [1], [0, 0, 1, 1], [], []>} : vector<8x72xbf16>, vector<72x32xbf16>, vector<8x32xf32> -> vector<8x32xf32>
    %6 = arith.addf %3, %5 : vector<8x32xf32>
    %c0_8 = arith.constant 0 : index
    %c0_9 = arith.constant 0 : index
    %7 = vector.load %arg8[%c0_8, %c0_9] : memref<8x1xf32, #tpu.memory_space<vmem>>, vector<8x1xf32>
    %8 = vector.broadcast %7 : vector<8x1xf32> to vector<8x32xf32>
    %9 = arith.addf %6, %8 : vector<8x32xf32>
    %10 = arith.negf %9 : vector<8x32xf32>
    %11 = math.exp %10 : vector<8x32xf32>
    %cst_10 = arith.constant 1.000000e+00 : f32
    %12 = vector.broadcast %cst_10 : f32 to vector<8x32xf32>
    %13 = arith.addf %12, %11 : vector<8x32xf32>
    %14 = arith.divf %12, %13 : vector<8x32xf32>
    %c0_11 = arith.constant 0 : index
    %c0_12 = arith.constant 0 : index
    %15 = vector.load %arg3[%c0_11, %c0_12] : memref<8x72xbf16, #tpu.memory_space<vmem>>, vector<8x72xbf16>
    %cst_13 = arith.constant dense<0.000000e+00> : vector<8x32xf32>
    %16 = tpu.matmul %15, %0, %cst_13 {dimension_numbers = #tpu.dot_dimension_numbers<[1], [0], [0], [1], [0, 0, 1, 1], [], []>} : vector<8x72xbf16>, vector<72x32xbf16>, vector<8x32xf32> -> vector<8x32xf32>
    %c0_14 = arith.constant 0 : index
    %c0_15 = arith.constant 0 : index
    %17 = vector.load %arg6[%c0_14, %c0_15] : memref<8x72xbf16, #tpu.memory_space<vmem>>, vector<8x72xbf16>
    %cst_16 = arith.constant dense<0.000000e+00> : vector<8x32xf32>
    %18 = tpu.matmul %17, %1, %cst_16 {dimension_numbers = #tpu.dot_dimension_numbers<[1], [0], [0], [1], [0, 0, 1, 1], [], []>} : vector<8x72xbf16>, vector<72x32xbf16>, vector<8x32xf32> -> vector<8x32xf32>
    %19 = arith.addf %16, %18 : vector<8x32xf32>
    %c0_17 = arith.constant 0 : index
    %c0_18 = arith.constant 0 : index
    %20 = vector.load %arg9[%c0_17, %c0_18] : memref<8x1xf32, #tpu.memory_space<vmem>>, vector<8x1xf32>
    %21 = vector.broadcast %20 : vector<8x1xf32> to vector<8x32xf32>
    %22 = arith.addf %19, %21 : vector<8x32xf32>
    %23 = arith.negf %22 : vector<8x32xf32>
    %24 = math.exp %23 : vector<8x32xf32>
    %cst_19 = arith.constant 1.000000e+00 : f32
    %25 = vector.broadcast %cst_19 : f32 to vector<8x32xf32>
    %26 = arith.addf %25, %24 : vector<8x32xf32>
    %27 = arith.divf %25, %26 : vector<8x32xf32>
    %c0_20 = arith.constant 0 : index
    %c0_21 = arith.constant 0 : index
    %28 = vector.load %arg4[%c0_20, %c0_21] : memref<8x72xbf16, #tpu.memory_space<vmem>>, vector<8x72xbf16>
    %cst_22 = arith.constant dense<0.000000e+00> : vector<8x32xf32>
    %29 = tpu.matmul %28, %0, %cst_22 {dimension_numbers = #tpu.dot_dimension_numbers<[1], [0], [0], [1], [0, 0, 1, 1], [], []>} : vector<8x72xbf16>, vector<72x32xbf16>, vector<8x32xf32> -> vector<8x32xf32>
    %c0_23 = arith.constant 0 : index
    %c0_24 = arith.constant 0 : index
    %30 = vector.load %arg10[%c0_23, %c0_24] : memref<8x1xf32, #tpu.memory_space<vmem>>, vector<8x1xf32>
    %31 = vector.broadcast %30 : vector<8x1xf32> to vector<8x32xf32>
    %32 = arith.addf %29, %31 : vector<8x32xf32>
    %c0_25 = arith.constant 0 : index
    %c0_26 = arith.constant 0 : index
    %33 = vector.load %arg7[%c0_25, %c0_26] : memref<8x72xbf16, #tpu.memory_space<vmem>>, vector<8x72xbf16>
    %cst_27 = arith.constant dense<0.000000e+00> : vector<8x32xf32>
    %34 = tpu.matmul %33, %1, %cst_27 {dimension_numbers = #tpu.dot_dimension_numbers<[1], [0], [0], [1], [0, 0, 1, 1], [], []>} : vector<8x72xbf16>, vector<72x32xbf16>, vector<8x32xf32> -> vector<8x32xf32>
    %c0_28 = arith.constant 0 : index
    %c0_29 = arith.constant 0 : index
    %35 = vector.load %arg11[%c0_28, %c0_29] : memref<8x1xf32, #tpu.memory_space<vmem>>, vector<8x1xf32>
    %36 = vector.broadcast %35 : vector<8x1xf32> to vector<8x32xf32>
    %37 = arith.addf %34, %36 : vector<8x32xf32>
    %38 = arith.mulf %27, %37 : vector<8x32xf32>
    %39 = arith.addf %32, %38 : vector<8x32xf32>
    %cst_30 = arith.constant 0.000000e+00 : f32
    %40 = vector.broadcast %cst_30 : f32 to vector<8x32xf32>
    %41 = arith.cmpf oge, %39, %40 : vector<8x32xf32>
    %cst_31 = arith.constant 2.000000e-01 : f32
    %42 = vector.broadcast %cst_31 : f32 to vector<8x32xf32>
    %43 = arith.mulf %42, %39 : vector<8x32xf32>
    %44 = arith.select %41, %39, %43 : vector<8x32xi1>, vector<8x32xf32>
    %cst_32 = arith.constant 1.000000e+00 : f32
    %45 = vector.broadcast %cst_32 : f32 to vector<8x32xf32>
    %46 = arith.subf %45, %14 : vector<8x32xf32>
    %47 = arith.mulf %46, %44 : vector<8x32xf32>
    %c0_33 = arith.constant 0 : index
    %c0_34 = arith.constant 0 : index
    %48 = vector.load %arg12[%c0_33, %c0_34] : memref<8x32xf32, #tpu.memory_space<vmem>>, vector<8x32xf32>
    %49 = arith.mulf %14, %48 : vector<8x32xf32>
    %50 = arith.addf %47, %49 : vector<8x32xf32>
    %c0_35 = arith.constant 0 : index
    %c0_36 = arith.constant 0 : index
    %51 = vector.load %arg13[%c0_35, %c0_36] : memref<8x32xf32, #tpu.memory_space<vmem>>, vector<8x32xf32>
    tpu.vector_store %arg13[%c0_35, %c0_36], %50 {strides = array<i32>} : memref<8x32xf32, #tpu.memory_space<vmem>>, vector<8x32xf32>,
    return
  }
}

module attributes {stable_mosaic.version = 11 : i64} {
  func.func @_mm_bias_kernel(%arg0: i32, %arg1: memref<8x128xbf16, #tpu.memory_space<vmem>>, %arg2: memref<128x128xbf16, #tpu.memory_space<vmem>>, %arg3: memref<8x1xf32, #tpu.memory_space<vmem>>, %arg4: memref<8x128xf32, #tpu.memory_space<vmem>>) attributes {dimension_semantics = [#tpu.dimension_semantics<parallel>], iteration_bounds = array<i64: 1>, scalar_prefetch = 0 : i64, scratch_operands = 0 : i64, tpu.core_type = #tpu.core_type<tc>, window_params = [{pipeline_mode = #tpu.pipeline_mode<synchronous>, transform_indices = @transform_0, window_bounds = array<i64: 8, 128>}, {transform_indices = @transform_1, window_bounds = array<i64: 128, 128>}, {pipeline_mode = #tpu.pipeline_mode<synchronous>, transform_indices = @transform_2, window_bounds = array<i64: 8, 1>}, {transform_indices = @transform_3, window_bounds = array<i64: 8, 128>}]} {
    %c0 = arith.constant 0 : index
    %c0_0 = arith.constant 0 : index
    %0 = vector.load %arg1[%c0, %c0_0] : memref<8x128xbf16, #tpu.memory_space<vmem>>, vector<8x128xbf16>
    %c0_1 = arith.constant 0 : index
    %c0_2 = arith.constant 0 : index
    %1 = vector.load %arg2[%c0_1, %c0_2] : memref<128x128xbf16, #tpu.memory_space<vmem>>, vector<128x128xbf16>
    %cst = arith.constant dense<0.000000e+00> : vector<8x128xf32>
    %2 = tpu.matmul %0, %1, %cst {dimension_numbers = #tpu.dot_dimension_numbers<[1], [0], [0], [1], [0, 0, 1, 1], [], []>} : vector<8x128xbf16>, vector<128x128xbf16>, vector<8x128xf32> -> vector<8x128xf32>
    %c0_3 = arith.constant 0 : index
    %c0_4 = arith.constant 0 : index
    %3 = vector.load %arg3[%c0_3, %c0_4] : memref<8x1xf32, #tpu.memory_space<vmem>>, vector<8x1xf32>
    %4 = vector.broadcast %3 : vector<8x1xf32> to vector<8x128xf32>
    %5 = arith.addf %2, %4 : vector<8x128xf32>
    %cst_5 = arith.constant 0.000000e+00 : f32
    %6 = vector.broadcast %cst_5 : f32 to vector<8x128xf32>
    %7 = arith.cmpf oge, %5, %6 : vector<8x128xf32>
    %cst_6 = arith.constant 2.000000e-01 : f32
    %8 = vector.broadcast %cst_6 : f32 to vector<8x128xf32>
    %9 = arith.mulf %8, %5 : vector<8x128xf32>
    %10 = arith.select %7, %5, %9 : vector<8x128xi1>, vector<8x128xf32>
    %c0_7 = arith.constant 0 : index
    %c0_8 = arith.constant 0 : index
    %11 = vector.load %arg4[%c0_7, %c0_8] : memref<8x128xf32, #tpu.memory_space<vmem>>, vector<8x128xf32>
    tpu.vector_store %arg4[%c0_7, %c0_8], %10 {strides = array<i32>} : memref<8x128xf32, #tpu.memory_space<vmem>>, vector<8x128xf32>,
    return
  }
  func.func @transform_0(%arg0: i32) -> (i32, i32) {
    %c0_i32 = arith.constant 0 : i32
    %c0_i32_0 = arith.constant 0 : i32
    %c0_i32_1 = arith.constant 0 : i32
    return %c0_i32, %c0_i32_0 : i32, i32
  }
  func.func @transform_1(%arg0: i32) -> (i32, i32) {
    %c0_i32 = arith.constant 0 : i32
    %c0_i32_0 = arith.constant 0 : i32
    return %c0_i32, %arg0 : i32, i32
  }
  func.func @transform_2(%arg0: i32) -> (i32, i32) {
    %c0_i32 = arith.constant 0 : i32
    %c0_i32_0 = arith.constant 0 : i32
    %c0_i32_1 = arith.constant 0 : i32
    return %c0_i32, %c0_i32_0 : i32, i32
  }
  func.func @transform_3(%arg0: i32) -> (i32, i32) {
    %c0_i32 = arith.constant 0 : i32
    %c0_i32_0 = arith.constant 0 : i32
    return %c0_i32, %arg0 : i32, i32
  }
}

module attributes {stable_mosaic.version = 11 : i64} {
  func.func @_mm_bias_kernel(%arg0: i32, %arg1: memref<4x192xbf16, #tpu.memory_space<vmem>>, %arg2: memref<192x256xbf16, #tpu.memory_space<vmem>>, %arg3: memref<4x1xf32, #tpu.memory_space<vmem>>, %arg4: memref<4x256xf32, #tpu.memory_space<vmem>>) attributes {dimension_semantics = [#tpu.dimension_semantics<parallel>], iteration_bounds = array<i64: 2>, scalar_prefetch = 0 : i64, scratch_operands = 0 : i64, tpu.core_type = #tpu.core_type<tc>, window_params = [{pipeline_mode = #tpu.pipeline_mode<synchronous>, transform_indices = @transform_0, window_bounds = array<i64: 4, 192>}, {transform_indices = @transform_1, window_bounds = array<i64: 192, 256>}, {pipeline_mode = #tpu.pipeline_mode<synchronous>, transform_indices = @transform_2, window_bounds = array<i64: 4, 1>}, {transform_indices = @transform_3, window_bounds = array<i64: 4, 256>}]} {
    %c0 = arith.constant 0 : index
    %c0_0 = arith.constant 0 : index
    %0 = vector.load %arg1[%c0, %c0_0] : memref<4x192xbf16, #tpu.memory_space<vmem>>, vector<4x192xbf16>
    %c0_1 = arith.constant 0 : index
    %c0_2 = arith.constant 0 : index
    %1 = vector.load %arg2[%c0_1, %c0_2] : memref<192x256xbf16, #tpu.memory_space<vmem>>, vector<192x256xbf16>
    %cst = arith.constant dense<0.000000e+00> : vector<4x256xf32>
    %2 = tpu.matmul %0, %1, %cst {dimension_numbers = #tpu.dot_dimension_numbers<[1], [0], [0], [1], [0, 0, 1, 1], [], []>} : vector<4x192xbf16>, vector<192x256xbf16>, vector<4x256xf32> -> vector<4x256xf32>
    %c0_3 = arith.constant 0 : index
    %c0_4 = arith.constant 0 : index
    %3 = vector.load %arg3[%c0_3, %c0_4] : memref<4x1xf32, #tpu.memory_space<vmem>>, vector<4x1xf32>
    %4 = vector.broadcast %3 : vector<4x1xf32> to vector<4x256xf32>
    %5 = arith.addf %2, %4 : vector<4x256xf32>
    %cst_5 = arith.constant 0.000000e+00 : f32
    %6 = vector.broadcast %cst_5 : f32 to vector<4x256xf32>
    %7 = arith.cmpf oge, %5, %6 : vector<4x256xf32>
    %cst_6 = arith.constant 2.000000e-01 : f32
    %8 = vector.broadcast %cst_6 : f32 to vector<4x256xf32>
    %9 = arith.mulf %8, %5 : vector<4x256xf32>
    %10 = arith.select %7, %5, %9 : vector<4x256xi1>, vector<4x256xf32>
    %c0_7 = arith.constant 0 : index
    %c0_8 = arith.constant 0 : index
    %11 = vector.load %arg4[%c0_7, %c0_8] : memref<4x256xf32, #tpu.memory_space<vmem>>, vector<4x256xf32>
    tpu.vector_store %arg4[%c0_7, %c0_8], %10 {strides = array<i32>} : memref<4x256xf32, #tpu.memory_space<vmem>>, vector<4x256xf32>,
    return
  }
  func.func @transform_0(%arg0: i32) -> (i32, i32) {
    %c0_i32 = arith.constant 0 : i32
    %c0_i32_0 = arith.constant 0 : i32
    %c0_i32_1 = arith.constant 0 : i32
    return %c0_i32, %c0_i32_0 : i32, i32
  }
  func.func @transform_1(%arg0: i32) -> (i32, i32) {
    %c0_i32 = arith.constant 0 : i32
    %c0_i32_0 = arith.constant 0 : i32
    return %c0_i32, %arg0 : i32, i32
  }
  func.func @transform_2(%arg0: i32) -> (i32, i32) {
    %c0_i32 = arith.constant 0 : i32
    %c0_i32_0 = arith.constant 0 : i32
    %c0_i32_1 = arith.constant 0 : i32
    return %c0_i32, %c0_i32_0 : i32, i32
  }
  func.func @transform_3(%arg0: i32) -> (i32, i32) {
    %c0_i32 = arith.constant 0 : i32
    %c0_i32_0 = arith.constant 0 : i32
    return %c0_i32, %arg0 : i32, i32
  }
}

module attributes {stable_mosaic.version = 11 : i64} {
  func.func @_mm_bias_kernel(%arg0: i32, %arg1: memref<1x4xbf16, #tpu.memory_space<vmem>>, %arg2: memref<4x256xbf16, #tpu.memory_space<vmem>>, %arg3: memref<1x1xf32, #tpu.memory_space<vmem>>, %arg4: memref<1x256xf32, #tpu.memory_space<vmem>>) attributes {dimension_semantics = [#tpu.dimension_semantics<parallel>], iteration_bounds = array<i64: 2>, scalar_prefetch = 0 : i64, scratch_operands = 0 : i64, tpu.core_type = #tpu.core_type<tc>, window_params = [{pipeline_mode = #tpu.pipeline_mode<synchronous>, transform_indices = @transform_0, window_bounds = array<i64: 1, 4>}, {transform_indices = @transform_1, window_bounds = array<i64: 4, 256>}, {pipeline_mode = #tpu.pipeline_mode<synchronous>, transform_indices = @transform_2, window_bounds = array<i64: 1, 1>}, {transform_indices = @transform_3, window_bounds = array<i64: 1, 256>}]} {
    %c0 = arith.constant 0 : index
    %c0_0 = arith.constant 0 : index
    %0 = vector.load %arg1[%c0, %c0_0] : memref<1x4xbf16, #tpu.memory_space<vmem>>, vector<1x4xbf16>
    %c0_1 = arith.constant 0 : index
    %c0_2 = arith.constant 0 : index
    %1 = vector.load %arg2[%c0_1, %c0_2] : memref<4x256xbf16, #tpu.memory_space<vmem>>, vector<4x256xbf16>
    %cst = arith.constant dense<0.000000e+00> : vector<1x256xf32>
    %2 = tpu.matmul %0, %1, %cst {dimension_numbers = #tpu.dot_dimension_numbers<[1], [0], [0], [1], [0, 0, 1, 1], [], []>} : vector<1x4xbf16>, vector<4x256xbf16>, vector<1x256xf32> -> vector<1x256xf32>
    %c0_3 = arith.constant 0 : index
    %c0_4 = arith.constant 0 : index
    %3 = vector.load %arg3[%c0_3, %c0_4] : memref<1x1xf32, #tpu.memory_space<vmem>>, vector<1x1xf32>
    %4 = vector.broadcast %3 : vector<1x1xf32> to vector<1x256xf32>
    %5 = arith.addf %2, %4 : vector<1x256xf32>
    %cst_5 = arith.constant 0.000000e+00 : f32
    %6 = vector.broadcast %cst_5 : f32 to vector<1x256xf32>
    %7 = arith.cmpf oge, %5, %6 : vector<1x256xf32>
    %cst_6 = arith.constant 2.000000e-01 : f32
    %8 = vector.broadcast %cst_6 : f32 to vector<1x256xf32>
    %9 = arith.mulf %8, %5 : vector<1x256xf32>
    %10 = arith.select %7, %5, %9 : vector<1x256xi1>, vector<1x256xf32>
    %cst_7 = arith.constant 0.14391157 : f32
    %11 = vector.broadcast %cst_7 : f32 to vector<1x256xf32>
    %12 = arith.mulf %10, %11 : vector<1x256xf32>
    %13 = math.exp %12 : vector<1x256xf32>
    %cst_8 = arith.constant 0.036463324 : f32
    %14 = vector.broadcast %cst_8 : f32 to vector<1x256xf32>
    %15 = arith.mulf %13, %14 : vector<1x256xf32>
    %c0_9 = arith.constant 0 : index
    %c0_10 = arith.constant 0 : index
    %16 = vector.load %arg4[%c0_9, %c0_10] : memref<1x256xf32, #tpu.memory_space<vmem>>, vector<1x256xf32>
    tpu.vector_store %arg4[%c0_9, %c0_10], %15 {strides = array<i32>} : memref<1x256xf32, #tpu.memory_space<vmem>>, vector<1x256xf32>,
    return
  }
  func.func @transform_0(%arg0: i32) -> (i32, i32) {
    %c0_i32 = arith.constant 0 : i32
    %c0_i32_0 = arith.constant 0 : i32
    %c0_i32_1 = arith.constant 0 : i32
    return %c0_i32, %c0_i32_0 : i32, i32
  }
  func.func @transform_1(%arg0: i32) -> (i32, i32) {
    %c0_i32 = arith.constant 0 : i32
    %c0_i32_0 = arith.constant 0 : i32
    return %c0_i32, %arg0 : i32, i32
  }
  func.func @transform_2(%arg0: i32) -> (i32, i32) {
    %c0_i32 = arith.constant 0 : i32
    %c0_i32_0 = arith.constant 0 : i32
    %c0_i32_1 = arith.constant 0 : i32
    return %c0_i32, %c0_i32_0 : i32, i32
  }
  func.func @transform_3(%arg0: i32) -> (i32, i32) {
    %c0_i32 = arith.constant 0 : i32
    %c0_i32_0 = arith.constant 0 : i32
    return %c0_i32, %arg0 : i32, i32
  }
}

</mosaic_0001>

<bundles_post_ra>
// kernel: model_forward.26
= control target key start
LH: loop header
LB: loop body
LE: loop exit
PB: predicated region body
PF: predicated region fallthrough
CT: control target
= control target key end

     0   :  { %vm33_vm0 = vcmask 1043456   ;;  %vm34_vm1 = vcmask 1044480   ;;  %v104_v0 = vmov 0.0   ;;  %v105_v2 = vmov 65535   ;;  %s140_s1 = inlined_call_operand.vmem [shape: bf16[9,128], index: 1, kind: input, shape index: {}]   ;;  %s141_s2 = inlined_call_operand.vmem [shape: f32[4,1], index: 2, kind: input, shape index: {}]   ;;  %s142_s0 = inlined_call_operand.vmem [shape: bf16[4,9], index: 0, kind: input, shape index: {}]   ;;  %s143_s3 = inlined_call_operand.vmem [shape: f32[4,128], index: 3, kind: output, shape index: {}]  }
   0x1   :  { %92 = vmatprep.subr.bf16.mxu0 %v104_v0  ;;  %v103_v1 = vld [vmem:[%s140_s1] sm:$0x1f]   ;;  %v35_v3 = vsel %vm33_vm0, 4294967295, %v105_v2  ;;  %vm106_vm2 = vmmov 0   ;;  %v107_v5 = vmov 0   ;;  %vm29_vm3 = vcmask 72704  }
   0x2   :  { %v36_v4 = vsel %vm34_vm1, %v35_v3, 0  ;;  %94 = vmatprep.mubr.msk.bf16.mxu0 %vm106_vm2, %v104_v0  ;;  %102 = vset.pattern.permute.xlu0 %v107_v5  ;;  %v18_v6 = vld [vmem:[%s141_s2] sm:$0xf] }
   0x3   :  { %v38_v7 = vand.u32 %v103_v1, %v36_v4  ;;  %21 = vperm.xlu0 %102, %v18_v6   ;;  %v15_v8 = vld [vmem:[%s142_s0] sm:$0x3] }
   0x5   :  { %93 = vmatpush3.bf16.msra.mxu0 %v38_v7 }
   0x8   :  { %95 = vmatmul.mubr.msk.bf16.vlgmr.msra.gmra.mrb[0].mxu0 %vm29_vm3, %v15_v8 }
  0x82   :  { %v22_v9 = vpop.permute.xlu0 %21 }
  0xdb   :  { %v74_v10 = vpop.f32.mrb[0].mxu0 }
  0xdc   :  { %v75_v11 = vadd.f32 %v74_v10, %v22_v9  ;;  %v96_v12 = vpop.f32.mrb[1].mxu0 }
  0xdd   :  { %v77_v13 = vpop.f32.mrb[2].mxu0 }
  0xde   :  { %vm80_vm4 = vcmp.ge.f32.partialorder %v75_v11, 0.0  ;;  %v81_v14 = vmul.f32 0.2, %v75_v11  ;;  %v97_v15 = vpop.f32.mrb[3].mxu0 }
  0xe0   :  { %v82_v16 = vsel %vm80_vm4, %v75_v11, %v81_v14 }
  0xe1   :  { %83 = vst [vmem:[%s143_s3] sm:$0xf] %v82_v16 }

// kernel: model_forward.23
= control target key start
LH: loop header
LB: loop body
LE: loop exit
PB: predicated region body
PF: predicated region fallthrough
CT: control target
= control target key end

     0   :  { %v527_v0 = vmov 0.0   ;;  %vm528_vm0 = vmmov 0   ;;  %v529_v4 = vmov 0   ;;  %vm76_vm1 = vcmask 1041408   ;;  %s705_s1 = inlined_call_operand.vmem [shape: bf16[36,128], index: 1, kind: input, shape index: {}]   ;;  %s706_s0 = inlined_call_operand.vmem [shape: bf16[36,128], index: 0, kind: input, shape index: {}]   ;;  %s707_s9 = inlined_call_operand.vmem [shape: f32[4,1], index: 9, kind: input, shape index: {}]   ;;  %s708_s11 = inlined_call_operand.vmem [shape: f32[4,1], index: 11, kind: input, shape index: {}]   ;;  %s709_s5 = inlined_call_operand.vmem [shape: bf16[4,36], index: 5, kind: input, shape index: {}]   ;;  %s710_s8 = inlined_call_operand.vmem [shape: f32[4,1], index: 8, kind: input, shape index: {}]   ;;  %s711_s2 = inlined_call_operand.vmem [shape: bf16[4,36], index: 2, kind: input, shape index: {}]   ;;  %s712_s10 = inlined_call_operand.vmem [shape: f32[4,1], index: 10, kind: input, shape index: {}]   ;;  %s713_s6 = inlined_call_operand.vmem [shape: bf16[4,36], index: 6, kind: input, shape index: {}]   ;;  %s714_s3 = inlined_call_operand.vmem [shape: bf16[4,36], index: 3, kind: input, shape index: {}]   ;;  %s715_s4 = inlined_call_operand.vmem [shape: bf16[4,36], index: 4, kind: input, shape index: {}]   ;;  %s716_s7 = inlined_call_operand.vmem [shape: bf16[4,36], index: 7, kind: input, shape index: {}]   ;;  %s717_s12 = inlined_call_operand.vmem [shape: f32[4,128], index: 12, kind: input, shape index: {}]   ;;  %s718_s13 = inlined_call_operand.vmem [shape: f32[4,128], index: 13, kind: output, shape index: {}]  }
   0x1   :  { %448 = vmatprep.subr.bf16.mxu0 %v527_v0  ;;  %458 = vmatprep.subr.bf16.mxu1 %v527_v0  ;;  %v605_v1 = vld [vmem:[%s705_s1] sm:$0xff]   ;;  %v620_v3 = vld [vmem:[%s705_s1 + $0x8] sm:$0xff]   ;;  %v517_v6 = vld [vmem:[%s705_s1 + $0x10] ss:$0 sps:$4 sm:$0x33]   ;;  %vm72_vm2 = vcmask 293888  }
   0x2   :  { %v610_v2 = vld [vmem:[%s706_s0] sm:$0xff]   ;;  %454 = vmatprep.mubr.msk.bf16.mxu0 %vm528_vm0, %v527_v0  ;;  %464 = vmatprep.mubr.msk.bf16.mxu1 %vm528_vm0, %v527_v0  ;;  %v516_v5 = vld [vmem:[%s706_s0 + $0x8] sm:$0xff]   ;;  %v518_v7 = vld [vmem:[%s706_s0 + $0x10] ss:$0 sps:$4 sm:$0x33]   ;;  %v78_v8 = vsel %vm76_vm1, %v517_v6, 0 }
   0x3   :  { %449 = vmatpush3.bf16.msra.mxu0 %v605_v1  ;;  %511 = vset.pattern.permute.xlu0 %v529_v4  ;;  %v139_v9 = vsel %vm76_vm1, %v518_v7, 0  ;;  %v282_v10 = vld [vmem:[%s707_s9] sm:$0xf] }
   0x4   :  { %459 = vmatpush3.bf16.msra.mxu1 %v610_v2  ;;  %450 = vmatprep.subr.bf16.mxu0 %v527_v0  ;;  %v346_v11 = vld [vmem:[%s708_s11] sm:$0xf] }
   0x5   :  { %460 = vmatprep.subr.bf16.mxu1 %v527_v0  ;;  %512 = vset.pattern.permute.xlu1 %v529_v4  ;;  %v56_v12 = vld [vmem:[%s709_s5] sm:$0x3] }
   0x6   :  { %285 = vperm.xlu0 %511, %v282_v10   ;;  %v181_v13 = vld [vmem:[%s710_s8] sm:$0xf]  ;;  %349 = vperm.xlu1 %512, %v346_v11  }
   0x7   :  { %451 = vmatpush3.bf16.msra.mxu0 %v620_v3  ;;  %v55_v14 = vld [vmem:[%s711_s2] sm:$0x3] }
   0x8   :  { %461 = vmatpush3.bf16.msra.mxu1 %v516_v5  ;;  %452 = vmatprep.subr.bf16.mxu0 %v527_v0  ;;  %v296_v15 = vld [vmem:[%s712_s10] sm:$0xf] }
   0x9   :  { %462 = vmatprep.subr.bf16.mxu1 %v527_v0  ;;  %v195_v16 = vld [vmem:[%s713_s6] sm:$0x3] }
   0xa   :  { %184 = vperm.xlu0 %511, %v181_v13   ;;  %299 = vperm.xlu1 %512, %v296_v15   ;;  %v194_v17 = vld [vmem:[%s714_s3] sm:$0x3] }
   0xb   :  { %453 = vmatpush3.bf16.msra.mxu0 %v78_v8  ;;  %v295_v18 = vld [vmem:[%s715_s4] sm:$0x3] }
   0xc   :  { %463 = vmatpush3.bf16.msra.mxu1 %v139_v9  ;;  %468 = vmatprep.subr.bf16.mxu0 %v527_v0  ;;  %v345_v19 = vld [vmem:[%s716_s7] sm:$0x3] }
   0xd   :  { %478 = vmatprep.subr.bf16.mxu1 %v527_v0 }
   0xe   :  { %455 = vmatmul.mubr.msk.bf16.vlgmr.msra.gmra.mrb[0].mxu0 %vm72_vm2, %v56_v12 }
   0xf   :  { %465 = vmatmul.mubr.msk.bf16.vlgmr.msra.gmra.mrb[0].mxu1 %vm72_vm2, %v55_v14  ;;  %469 = vmatpush3.bf16.msra.mxu0 %v605_v1 }
  0x10   :  { %479 = vmatpush3.bf16.msra.mxu1 %v610_v2  ;;  %470 = vmatprep.subr.bf16.mxu0 %v527_v0 }
  0x11   :  { %480 = vmatprep.subr.bf16.mxu1 %v527_v0  ;;  %474 = vmatprep.mubr.msk.bf16.mxu0 %vm528_vm0, %v527_v0 }
  0x12   :  { %484 = vmatprep.mubr.msk.bf16.mxu1 %vm528_vm0, %v527_v0 }
  0x13   :  { %471 = vmatpush3.bf16.msra.mxu0 %v620_v3 }
  0x14   :  { %481 = vmatpush3.bf16.msra.mxu1 %v516_v5  ;;  %472 = vmatprep.subr.bf16.mxu0 %v527_v0 }
  0x15   :  { %482 = vmatprep.subr.bf16.mxu1 %v527_v0 }
  0x17   :  { %473 = vmatpush3.bf16.msra.mxu0 %v78_v8 }
  0x18   :  { %483 = vmatpush3.bf16.msra.mxu1 %v139_v9  ;;  %488 = vmatprep.subr.bf16.mxu0 %v527_v0 }
  0x19   :  { %498 = vmatprep.subr.bf16.mxu1 %v527_v0 }
  0x1a   :  { %475 = vmatmul.mubr.msk.bf16.vlgmr.msra.gmra.mrb[4].mxu0 %vm72_vm2, %v195_v16 }
  0x1b   :  { %485 = vmatmul.mubr.msk.bf16.vlgmr.msra.gmra.mrb[4].mxu1 %vm72_vm2, %v194_v17  ;;  %489 = vmatpush3.bf16.msra.mxu0 %v610_v2 }
  0x1c   :  { %499 = vmatpush3.bf16.msra.mxu1 %v605_v1  ;;  %490 = vmatprep.subr.bf16.mxu0 %v527_v0  ;;  %v402_v1 = vld [vmem:[%s717_s12] sm:$0xf] }
  0x1d   :  { %500 = vmatprep.subr.bf16.mxu1 %v527_v0  ;;  %504 = vmatprep.mubr.msk.bf16.mxu1 %vm528_vm0, %v527_v0 }
  0x1e   :  { %494 = vmatprep.mubr.msk.bf16.mxu0 %vm528_vm0, %v527_v0 }
  0x1f   :  { %491 = vmatpush3.bf16.msra.mxu0 %v516_v5 }
  0x20   :  { %501 = vmatpush3.bf16.msra.mxu1 %v620_v3  ;;  %492 = vmatprep.subr.bf16.mxu0 %v527_v0 }
  0x21   :  { %502 = vmatprep.subr.bf16.mxu1 %v527_v0 }
  0x23   :  { %493 = vmatpush3.bf16.msra.mxu0 %v139_v9 }
  0x24   :  { %503 = vmatpush3.bf16.msra.mxu1 %v78_v8 }
  0x26   :  { %495 = vmatmul.mubr.msk.bf16.vlgmr.msra.gmra.mrb[8].mxu0 %vm72_vm2, %v295_v18 }
  0x27   :  { %505 = vmatmul.mubr.msk.bf16.vlgmr.msra.gmra.mrb[8].mxu1 %vm72_vm2, %v345_v19 }
  0x85   :  { %v286_v20 = vpop.permute.xlu0 %285  ;;  %v350_v56 = vpop.permute.xlu1 %349 }
  0x89   :  { %v185_v30 = vpop.permute.xlu0 %184  ;;  %v300_v57 = vpop.permute.xlu1 %299 }
  0xe1   :  { %v114_v21 = vpop.f32.mrb[0].mxu0 }
  0xe2   :  { %v175_v22 = vpop.f32.mrb[0].mxu1  ;;  %v456_v23 = vpop.f32.mrb[1].mxu0 }
  0xe3   :  { %v176_v24 = vadd.f32 %v175_v22, %v114_v21  ;;  %v466_v25 = vpop.f32.mrb[1].mxu1  ;;  %v117_v26 = vpop.f32.mrb[2].mxu0 }
  0xe4   :  { %v178_v27 = vpop.f32.mrb[2].mxu1  ;;  %v457_v28 = vpop.f32.mrb[3].mxu0 }
  0xe5   :  { %v467_v29 = vpop.f32.mrb[3].mxu1  ;;  %v187_v31 = vadd.f32 %v185_v30, %v176_v24 }
  0xe7   :  { %v418_v38 = vmul.f32 -1.442695, %v187_v31 }
  0xe9   :  { %519 = vpow2.f32 %v418_v38 }
  0xed   :  { %v233_v32 = vpop.f32.mrb[4].mxu0 }
  0xee   :  { %v276_v33 = vpop.f32.mrb[4].mxu1  ;;  %v476_v34 = vpop.f32.mrb[5].mxu0 }
  0xef   :  { %v277_v35 = vadd.f32 %v276_v33, %v233_v32  ;;  %v486_v36 = vpop.f32.mrb[5].mxu1  ;;  %v236_v37 = vpop.f32.mrb[6].mxu0 }
  0xf0   :  { %v279_v39 = vpop.f32.mrb[6].mxu1  ;;  %v477_v40 = vpop.f32.mrb[7].mxu0 }
  0xf1   :  { %v288_v41 = vadd.f32 %v286_v20, %v277_v35  ;;  %v487_v42 = vpop.f32.mrb[7].mxu1 }
  0xf3   :  { %v421_v43 = vmul.f32 -1.442695, %v288_v41  ;;  %v520_v52 = vpop.eup %519 }
  0xf4   :  { %v191_v55 = vadd.f32 1.0, %v520_v52 }
  0xf5   :  { %521 = vpow2.f32 %v421_v43 }
  0xf9   :  { %v339_v44 = vpop.f32.mrb[8].mxu0 }
  0xfa   :  { %v389_v45 = vpop.f32.mrb[8].mxu1  ;;  %v496_v46 = vpop.f32.mrb[9].mxu0  ;;  %v340_v61 = vadd.f32 %v339_v44, %v300_v57 }
  0xfb   :  { %v506_v47 = vpop.f32.mrb[9].mxu1  ;;  %v342_v48 = vpop.f32.mrb[10].mxu0  ;;  %v390_v58 = vadd.f32 %v389_v45, %v350_v56 }
  0xfc   :  { %v392_v49 = vpop.f32.mrb[10].mxu1  ;;  %v497_v50 = vpop.f32.mrb[11].mxu0 }
  0xfd   :  { %v507_v51 = vpop.f32.mrb[11].mxu1 }
  0xff   :  { %v522_v53 = vpop.eup %521 }
 0x100   :  { %v292_v54 = vadd.f32 1.0, %v522_v53 }
 0x102   :  { %523 = vrcp.f32 %v292_v54 }
 0x103   :  { %525 = vrcp.f32 %v191_v55 }
 0x10c   :  { %v524_v59 = vpop.eup %523 }
 0x10d   :  { %v395_v60 = vmul.f32 %v524_v59, %v390_v58  ;;  %v526_v62 = vpop.eup %525 }
 0x10e   :  { %v400_v2 = vsub.f32 1.0, %v526_v62  ;;  %v403_v5 = vmul.f32 %v526_v62, %v402_v1 }
 0x10f   :  { %v396_v63 = vadd.f32 %v395_v60, %v340_v61 }
 0x111   :  { %vm397_vm3 = vcmp.ge.f32.partialorder %v396_v63, 0.0  ;;  %v398_v0 = vmul.f32 0.2, %v396_v63 }
 0x113   :  { %v399_v3 = vsel %vm397_vm3, %v396_v63, %v398_v0 }
 0x114   :  { %v401_v4 = vmul.f32 %v400_v2, %v399_v3 }
 0x116   :  { %v404_v6 = vadd.f32 %v403_v5, %v401_v4 }
 0x118   :  { %405 = vst [vmem:[%s718_s13] sm:$0xf] %v404_v6 }

// kernel: model_forward.28
= control target key start
LH: loop header
LB: loop body
LE: loop exit
PB: predicated region body
PF: predicated region fallthrough
CT: control target
= control target key end

     0   :  { %v124_v0 = vmov 0.0   ;;  %vm125_vm0 = vmmov 0   ;;  %v126_v2 = vmov 0   ;;  %vm46_vm1 = vcmask 1041408   ;;  %s165_s1 = inlined_call_operand.vmem [shape: bf16[36,32], index: 1, kind: input, shape index: {}]   ;;  %s166_s2 = inlined_call_operand.vmem [shape: f32[8,1], index: 2, kind: input, shape index: {}]   ;;  %s167_s0 = inlined_call_operand.vmem [shape: bf16[8,36], index: 0, kind: input, shape index: {}]   ;;  %s168_s3 = inlined_call_operand.vmem [shape: f32[8,32], index: 3, kind: output, shape index: {}]  }
   0x1   :  { %107 = vmatprep.subr.bf16.mxu0 %v124_v0  ;;  %v121_v1 = vld [vmem:[%s165_s1] sm:$0xff]   ;;  %113 = vmatprep.mubr.msk.bf16.mxu0 %vm125_vm0, %v124_v0  ;;  %v122_v3 = vld [vmem:[%s165_s1 + $0x8] sm:$0xff]   ;;  %v123_v5 = vld [vmem:[%s165_s1 + $0x10] ss:$0 sps:$4 sm:$0x33]   ;;  %vm42_vm2 = vcmask 293888  }
   0x2   :  { %120 = vset.pattern.permute.xlu0 %v126_v2  ;;  %108 = vmatpush3.bf16.msra.mxu0 %v121_v1  ;;  %v21_v4 = vld [vmem:[%s166_s2] sm:$0xff]  ;;  %v48_v6 = vsel %vm46_vm1, %v123_v5, 0  ;;  %vm93_vm4 = vcmask 261120  }
   0x3   :  { %109 = vmatprep.subr.bf16.mxu0 %v124_v0  ;;  %24 = vperm.xlu0 %120, %v21_v4   ;;  %v15_v7 = vld [vmem:[%s167_s0] sm:$0xf] }
   0x6   :  { %110 = vmatpush3.bf16.msra.mxu0 %v122_v3 }
   0x7   :  { %111 = vmatprep.subr.bf16.mxu0 %v124_v0 }
   0xa   :  { %112 = vmatpush3.bf16.msra.mxu0 %v48_v6 }
   0xd   :  { %114 = vmatmul.mubr.msk.bf16.vlgmr.msra.gmra.mrb[0].mxu0 %vm42_vm2, %v15_v7 }
  0x82   :  { %v25_v8 = vpop.permute.xlu0 %24 }
  0xe0   :  { %v84_v9 = vpop.f32.mrb[0].mxu0 }
  0xe1   :  { %v85_v10 = vadd.f32 %v84_v9, %v25_v8  ;;  %v115_v11 = vpop.f32.mrb[1].mxu0 }
  0xe2   :  { %v87_v12 = vpop.f32.mrb[2].mxu0 }
  0xe3   :  { %vm90_vm3 = vcmp.ge.f32.partialorder %v85_v10, 0.0  ;;  %v91_v13 = vmul.f32 0.2, %v85_v10  ;;  %v116_v14 = vpop.f32.mrb[3].mxu0 }
  0xe5   :  { %v92_v15 = vsel %vm90_vm3, %v85_v10, %v91_v13 }
  0xe6   :  { %94 = vst.msk [vmem:[%s168_s3] sm:$0xff] %vm93_vm4, %v92_v15 }

// kernel: model_forward.25
= control target key start
LH: loop header
LB: loop body
LE: loop exit
PB: predicated region body
PF: predicated region fallthrough
CT: control target
= control target key end

     0   :  { %v604_v0 = vmov 0.0   ;;  %vm605_vm0 = vmmov 0   ;;  %v606_v4 = vmov 0   ;;  %vm96_vm1 = vcmask 1043456   ;;  %s836_s1 = inlined_call_operand.vmem [shape: bf16[72,32], index: 1, kind: input, shape index: {}]   ;;  %s837_s0 = inlined_call_operand.vmem [shape: bf16[72,32], index: 0, kind: input, shape index: {}]   ;;  %s838_s9 = inlined_call_operand.vmem [shape: f32[8,1], index: 9, kind: input, shape index: {}]   ;;  %s839_s11 = inlined_call_operand.vmem [shape: f32[8,1], index: 11, kind: input, shape index: {}]   ;;  %s840_s8 = inlined_call_operand.vmem [shape: f32[8,1], index: 8, kind: input, shape index: {}]   ;;  %s841_s10 = inlined_call_operand.vmem [shape: f32[8,1], index: 10, kind: input, shape index: {}]   ;;  %s842_s5 = inlined_call_operand.vmem [shape: bf16[8,72], index: 5, kind: input, shape index: {}]   ;;  %s843_s2 = inlined_call_operand.vmem [shape: bf16[8,72], index: 2, kind: input, shape index: {}]   ;;  %s844_s6 = inlined_call_operand.vmem [shape: bf16[8,72], index: 6, kind: input, shape index: {}]   ;;  %s845_s3 = inlined_call_operand.vmem [shape: bf16[8,72], index: 3, kind: input, shape index: {}]   ;;  %s846_s4 = inlined_call_operand.vmem [shape: bf16[8,72], index: 4, kind: input, shape index: {}]   ;;  %s847_s7 = inlined_call_operand.vmem [shape: bf16[8,72], index: 7, kind: input, shape index: {}]   ;;  %s848_s12 = inlined_call_operand.vmem [shape: f32[8,32], index: 12, kind: input, shape index: {}]   ;;  %s849_s13 = inlined_call_operand.vmem [shape: f32[8,32], index: 13, kind: output, shape index: {}]  }
   0x1   :  { %497 = vmatprep.subr.bf16.mxu0 %v604_v0  ;;  %511 = vmatprep.subr.bf16.mxu1 %v604_v0  ;;  %v682_v1 = vld [vmem:[%s836_s1] sm:$0xff]   ;;  %v697_v3 = vld [vmem:[%s836_s1 + $0x8] sm:$0xff]   ;;  %v711_v6 = vld [vmem:[%s836_s1 + $0x10] sm:$0xff]   ;;  %vm92_vm2 = vcmask 588800   ;;  %vm437_vm4 = vcmask 261120  }
   0x2   :  { %v687_v2 = vld [vmem:[%s837_s0] sm:$0xff]   ;;  %507 = vmatprep.mubr.msk.bf16.mxu0 %vm605_vm0, %v604_v0  ;;  %521 = vmatprep.mubr.msk.bf16.mxu1 %vm605_vm0, %v604_v0  ;;  %v704_v5 = vld [vmem:[%s837_s0 + $0x8] sm:$0xff]   ;;  %v718_v7 = vld [vmem:[%s837_s0 + $0x10] sm:$0xff]  }
   0x3   :  { %498 = vmatpush3.bf16.msra.mxu0 %v682_v1  ;;  %584 = vset.pattern.permute.xlu0 %v606_v4  ;;  %v725_v8 = vld [vmem:[%s836_s1 + $0x18] sm:$0xff]   ;;  %v314_v9 = vld [vmem:[%s838_s9] sm:$0xff] }
   0x4   :  { %512 = vmatpush3.bf16.msra.mxu1 %v687_v2  ;;  %499 = vmatprep.subr.bf16.mxu0 %v604_v0  ;;  %v735_v10 = vld [vmem:[%s837_s0 + $0x18] sm:$0xff]   ;;  %v594_v11 = vld [vmem:[%s836_s1 + $0x20] ss:$0 sps:$4 sm:$0xff]  }
   0x5   :  { %513 = vmatprep.subr.bf16.mxu1 %v604_v0  ;;  %585 = vset.pattern.permute.xlu1 %v606_v4  ;;  %v595_v12 = vld [vmem:[%s837_s0 + $0x20] ss:$0 sps:$4 sm:$0xff]   ;;  %v756_v16 = vsel %vm96_vm1, %v594_v11, 0 }
   0x6   :  { %317 = vperm.xlu0 %584, %v314_v9   ;;  %v378_v13 = vld [vmem:[%s839_s11] sm:$0xff]  ;;  %v171_v17 = vsel %vm96_vm1, %v595_v12, 0 }
   0x7   :  { %500 = vmatpush3.bf16.msra.mxu0 %v697_v3  ;;  %v213_v14 = vld [vmem:[%s840_s8] sm:$0xff]  ;;  %381 = vperm.xlu1 %585, %v378_v13  }
   0x8   :  { %514 = vmatpush3.bf16.msra.mxu1 %v704_v5  ;;  %501 = vmatprep.subr.bf16.mxu0 %v604_v0  ;;  %v328_v15 = vld [vmem:[%s841_s10] sm:$0xff] }
   0x9   :  { %515 = vmatprep.subr.bf16.mxu1 %v604_v0  ;;  %v64_v18 = vld [vmem:[%s842_s5] sm:$0xf] }
   0xa   :  { %216 = vperm.xlu0 %584, %v213_v14   ;;  %v63_v19 = vld [vmem:[%s843_s2] sm:$0xf] }
   0xb   :  { %502 = vmatpush3.bf16.msra.mxu0 %v711_v6  ;;  %331 = vperm.xlu1 %585, %v328_v15   ;;  %v227_v20 = vld [vmem:[%s844_s6] sm:$0xf] }
   0xc   :  { %516 = vmatpush3.bf16.msra.mxu1 %v718_v7  ;;  %503 = vmatprep.subr.bf16.mxu0 %v604_v0  ;;  %v226_v21 = vld [vmem:[%s845_s3] sm:$0xf] }
   0xd   :  { %517 = vmatprep.subr.bf16.mxu1 %v604_v0  ;;  %v327_v22 = vld [vmem:[%s846_s4] sm:$0xf] }
   0xe   :  { %v377_v23 = vld [vmem:[%s847_s7] sm:$0xf] }
   0xf   :  { %504 = vmatpush3.bf16.msra.mxu0 %v725_v8 }
  0x10   :  { %518 = vmatpush3.bf16.msra.mxu1 %v735_v10  ;;  %505 = vmatprep.subr.bf16.mxu0 %v604_v0 }
  0x11   :  { %519 = vmatprep.subr.bf16.mxu1 %v604_v0 }
  0x13   :  { %506 = vmatpush3.bf16.msra.mxu0 %v756_v16 }
  0x14   :  { %520 = vmatpush3.bf16.msra.mxu1 %v171_v17  ;;  %525 = vmatprep.subr.bf16.mxu0 %v604_v0 }
  0x15   :  { %539 = vmatprep.subr.bf16.mxu1 %v604_v0 }
  0x16   :  { %508 = vmatmul.mubr.msk.bf16.vlgmr.msra.gmra.mrb[0].mxu0 %vm92_vm2, %v64_v18 }
  0x17   :  { %522 = vmatmul.mubr.msk.bf16.vlgmr.msra.gmra.mrb[0].mxu1 %vm92_vm2, %v63_v19  ;;  %526 = vmatpush3.bf16.msra.mxu0 %v682_v1 }
  0x18   :  { %540 = vmatpush3.bf16.msra.mxu1 %v687_v2  ;;  %527 = vmatprep.subr.bf16.mxu0 %v604_v0 }
  0x19   :  { %541 = vmatprep.subr.bf16.mxu1 %v604_v0  ;;  %535 = vmatprep.mubr.msk.bf16.mxu0 %vm605_vm0, %v604_v0 }
  0x1a   :  { %549 = vmatprep.mubr.msk.bf16.mxu1 %vm605_vm0, %v604_v0 }
  0x1b   :  { %528 = vmatpush3.bf16.msra.mxu0 %v697_v3 }
  0x1c   :  { %542 = vmatpush3.bf16.msra.mxu1 %v704_v5  ;;  %529 = vmatprep.subr.bf16.mxu0 %v604_v0 }
  0x1d   :  { %543 = vmatprep.subr.bf16.mxu1 %v604_v0 }
  0x1f   :  { %530 = vmatpush3.bf16.msra.mxu0 %v711_v6 }
  0x20   :  { %544 = vmatpush3.bf16.msra.mxu1 %v718_v7  ;;  %531 = vmatprep.subr.bf16.mxu0 %v604_v0 }
  0x21   :  { %545 = vmatprep.subr.bf16.mxu1 %v604_v0 }
  0x23   :  { %532 = vmatpush3.bf16.msra.mxu0 %v725_v8 }
  0x24   :  { %546 = vmatpush3.bf16.msra.mxu1 %v735_v10  ;;  %533 = vmatprep.subr.bf16.mxu0 %v604_v0 }
  0x25   :  { %547 = vmatprep.subr.bf16.mxu1 %v604_v0 }
  0x27   :  { %534 = vmatpush3.bf16.msra.mxu0 %v756_v16 }
  0x28   :  { %548 = vmatpush3.bf16.msra.mxu1 %v171_v17  ;;  %553 = vmatprep.subr.bf16.mxu0 %v604_v0 }
  0x29   :  { %567 = vmatprep.subr.bf16.mxu1 %v604_v0 }
  0x2a   :  { %536 = vmatmul.mubr.msk.bf16.vlgmr.msra.gmra.mrb[4].mxu0 %vm92_vm2, %v227_v20 }
  0x2b   :  { %550 = vmatmul.mubr.msk.bf16.vlgmr.msra.gmra.mrb[4].mxu1 %vm92_vm2, %v226_v21  ;;  %554 = vmatpush3.bf16.msra.mxu0 %v687_v2 }
  0x2c   :  { %568 = vmatpush3.bf16.msra.mxu1 %v682_v1  ;;  %555 = vmatprep.subr.bf16.mxu0 %v604_v0 }
  0x2d   :  { %569 = vmatprep.subr.bf16.mxu1 %v604_v0  ;;  %577 = vmatprep.mubr.msk.bf16.mxu1 %vm605_vm0, %v604_v0 }
  0x2e   :  { %563 = vmatprep.mubr.msk.bf16.mxu0 %vm605_vm0, %v604_v0 }
  0x2f   :  { %556 = vmatpush3.bf16.msra.mxu0 %v704_v5  ;;  %v434_v5 = vld [vmem:[%s848_s12] sm:$0xff] }
  0x30   :  { %570 = vmatpush3.bf16.msra.mxu1 %v697_v3  ;;  %557 = vmatprep.subr.bf16.mxu0 %v604_v0 }
  0x31   :  { %571 = vmatprep.subr.bf16.mxu1 %v604_v0 }
  0x33   :  { %558 = vmatpush3.bf16.msra.mxu0 %v718_v7 }
  0x34   :  { %572 = vmatpush3.bf16.msra.mxu1 %v711_v6  ;;  %559 = vmatprep.subr.bf16.mxu0 %v604_v0 }
  0x35   :  { %573 = vmatprep.subr.bf16.mxu1 %v604_v0 }
  0x37   :  { %560 = vmatpush3.bf16.msra.mxu0 %v735_v10 }
  0x38   :  { %574 = vmatpush3.bf16.msra.mxu1 %v725_v8  ;;  %561 = vmatprep.subr.bf16.mxu0 %v604_v0 }
  0x39   :  { %575 = vmatprep.subr.bf16.mxu1 %v604_v0 }
  0x3b   :  { %562 = vmatpush3.bf16.msra.mxu0 %v171_v17 }
  0x3c   :  { %576 = vmatpush3.bf16.msra.mxu1 %v756_v16 }
  0x3e   :  { %564 = vmatmul.mubr.msk.bf16.vlgmr.msra.gmra.mrb[8].mxu0 %vm92_vm2, %v327_v22 }
  0x3f   :  { %578 = vmatmul.mubr.msk.bf16.vlgmr.msra.gmra.mrb[8].mxu1 %vm92_vm2, %v377_v23 }
  0x85   :  { %v318_v33 = vpop.permute.xlu0 %317 }
  0x86   :  { %v382_v52 = vpop.permute.xlu1 %381 }
  0x89   :  { %v217_v34 = vpop.permute.xlu0 %216 }
  0x8a   :  { %v332_v61 = vpop.permute.xlu1 %331 }
  0xe9   :  { %v134_v24 = vpop.f32.mrb[0].mxu0 }
  0xea   :  { %v207_v25 = vpop.f32.mrb[0].mxu1  ;;  %v509_v26 = vpop.f32.mrb[1].mxu0 }
  0xeb   :  { %v208_v27 = vadd.f32 %v207_v25, %v134_v24  ;;  %v523_v28 = vpop.f32.mrb[1].mxu1  ;;  %v137_v29 = vpop.f32.mrb[2].mxu0 }
  0xec   :  { %v210_v30 = vpop.f32.mrb[2].mxu1  ;;  %v510_v31 = vpop.f32.mrb[3].mxu0 }
  0xed   :  { %v524_v32 = vpop.f32.mrb[3].mxu1  ;;  %v219_v35 = vadd.f32 %v217_v34, %v208_v27 }
  0xef   :  { %v455_v42 = vmul.f32 -1.442695, %v219_v35 }
  0xf1   :  { %596 = vpow2.f32 %v455_v42 }
  0xfb   :  { %v597_v48 = vpop.eup %596 }
  0xfc   :  { %v223_v51 = vadd.f32 1.0, %v597_v48 }
  0xfd   :  { %v265_v36 = vpop.f32.mrb[4].mxu0 }
  0xfe   :  { %v308_v37 = vpop.f32.mrb[4].mxu1  ;;  %v537_v38 = vpop.f32.mrb[5].mxu0 }
  0xff   :  { %v309_v39 = vadd.f32 %v308_v37, %v265_v36  ;;  %v551_v40 = vpop.f32.mrb[5].mxu1  ;;  %v268_v41 = vpop.f32.mrb[6].mxu0 }
 0x100   :  { %v311_v43 = vpop.f32.mrb[6].mxu1  ;;  %v538_v44 = vpop.f32.mrb[7].mxu0 }
 0x101   :  { %v320_v45 = vadd.f32 %v318_v33, %v309_v39  ;;  %v552_v46 = vpop.f32.mrb[7].mxu1 }
 0x103   :  { %v458_v47 = vmul.f32 -1.442695, %v320_v45 }
 0x105   :  { %598 = vpow2.f32 %v458_v47 }
 0x10f   :  { %v599_v49 = vpop.eup %598 }
 0x110   :  { %v324_v50 = vadd.f32 1.0, %v599_v49 }
 0x111   :  { %v371_v53 = vpop.f32.mrb[8].mxu0 }
 0x112   :  { %600 = vrcp.f32 %v324_v50  ;;  %v421_v54 = vpop.f32.mrb[8].mxu1  ;;  %v565_v55 = vpop.f32.mrb[9].mxu0  ;;  %v372_v1 = vadd.f32 %v371_v53, %v332_v61 }
 0x113   :  { %v579_v56 = vpop.f32.mrb[9].mxu1  ;;  %v374_v57 = vpop.f32.mrb[10].mxu0  ;;  %602 = vrcp.f32 %v223_v51  ;;  %v422_v62 = vadd.f32 %v421_v54, %v382_v52 }
 0x114   :  { %v424_v58 = vpop.f32.mrb[10].mxu1  ;;  %v566_v59 = vpop.f32.mrb[11].mxu0 }
 0x115   :  { %v580_v60 = vpop.f32.mrb[11].mxu1 }
 0x11c   :  { %v601_v63 = vpop.eup %600 }
 0x11d   :  { %v427_v0 = vmul.f32 %v601_v63, %v422_v62  ;;  %v603_v2 = vpop.eup %602 }
 0x11e   :  { %v432_v6 = vsub.f32 1.0, %v603_v2  ;;  %v435_v9 = vmul.f32 %v603_v2, %v434_v5 }
 0x11f   :  { %v428_v3 = vadd.f32 %v427_v0, %v372_v1 }
 0x121   :  { %vm429_vm3 = vcmp.ge.f32.partialorder %v428_v3, 0.0  ;;  %v430_v4 = vmul.f32 0.2, %v428_v3 }
 0x123   :  { %v431_v7 = vsel %vm429_vm3, %v428_v3, %v430_v4 }
 0x124   :  { %v433_v8 = vmul.f32 %v432_v6, %v431_v7 }
 0x126   :  { %v436_v10 = vadd.f32 %v435_v9, %v433_v8 }
 0x128   :  { %438 = vst.msk [vmem:[%s849_s13] sm:$0xff] %vm437_vm4, %v436_v10 }

// kernel: model_forward.41
= control target key start
LH: loop header
LB: loop body
LE: loop exit
PB: predicated region body
PF: predicated region fallthrough
CT: control target
= control target key end

     0   :  { %v183_v0 = vmov 0.0   ;;  %vm184_vm0 = vmmov 0   ;;  %v185_v2 = vmov 0   ;;  %s239_s1 = inlined_call_operand.vmem [shape: bf16[128,128], index: 1, kind: input, shape index: {}]   ;;  %s240_s2 = inlined_call_operand.vmem [shape: f32[8,1], index: 2, kind: input, shape index: {}]   ;;  %s241_s0 = inlined_call_operand.vmem [shape: bf16[8,128], index: 0, kind: input, shape index: {}]   ;;  %s242_s3 = inlined_call_operand.vmem [shape: f32[8,128], index: 3, kind: output, shape index: {}]  }
   0x1   :  { %151 = vmatprep.subr.bf16.mxu0 %v183_v0  ;;  %v175_v1 = vld [vmem:[%s239_s1] sm:$0xff]   ;;  %167 = vmatprep.mubr.msk.bf16.mxu0 %vm184_vm0, %v183_v0  ;;  %v176_v3 = vld [vmem:[%s239_s1 + $0x8] sm:$0xff]   ;;  %v177_v4 = vld [vmem:[%s239_s1 + $0x10] sm:$0xff]  }
   0x2   :  { %174 = vset.pattern.permute.xlu0 %v185_v2  ;;  %152 = vmatpush3.bf16.msra.mxu0 %v175_v1  ;;  %v32_v5 = vld [vmem:[%s240_s2] sm:$0xff]  ;;  %v178_v6 = vld [vmem:[%s239_s1 + $0x18] sm:$0xff]   ;;  %v180_v8 = vld [vmem:[%s239_s1 + $0x28] sm:$0xff]  }
   0x3   :  { %153 = vmatprep.subr.bf16.mxu0 %v183_v0  ;;  %35 = vperm.xlu0 %174, %v32_v5   ;;  %v179_v7 = vld [vmem:[%s239_s1 + $0x20] sm:$0xff]   ;;  %v181_v9 = vld [vmem:[%s239_s1 + $0x30] sm:$0xff]   ;;  %v182_v10 = vld [vmem:[%s239_s1 + $0x38] sm:$0xff]  }
   0x4   :  { %v15_v11 = vld [vmem:[%s241_s0] sm:$0xf] }
   0x6   :  { %154 = vmatpush3.bf16.msra.mxu0 %v176_v3 }
   0x7   :  { %155 = vmatprep.subr.bf16.mxu0 %v183_v0 }
   0xa   :  { %156 = vmatpush3.bf16.msra.mxu0 %v177_v4 }
   0xb   :  { %157 = vmatprep.subr.bf16.mxu0 %v183_v0 }
   0xe   :  { %158 = vmatpush3.bf16.msra.mxu0 %v178_v6 }
   0xf   :  { %159 = vmatprep.subr.bf16.mxu0 %v183_v0 }
  0x12   :  { %160 = vmatpush3.bf16.msra.mxu0 %v179_v7 }
  0x13   :  { %161 = vmatprep.subr.bf16.mxu0 %v183_v0 }
  0x16   :  { %162 = vmatpush3.bf16.msra.mxu0 %v180_v8 }
  0x17   :  { %163 = vmatprep.subr.bf16.mxu0 %v183_v0 }
  0x1a   :  { %164 = vmatpush3.bf16.msra.mxu0 %v181_v9 }
  0x1b   :  { %165 = vmatprep.subr.bf16.mxu0 %v183_v0 }
  0x1e   :  { %166 = vmatpush3.bf16.msra.mxu0 %v182_v10 }
  0x21   :  { %168 = vmatmul.mubr.bf16.vlgmr.msra.gmra.mrb[0].mxu0 %v15_v11 }
  0x82   :  { %v36_v12 = vpop.permute.xlu0 %35 }
  0xf4   :  { %v120_v13 = vpop.f32.mrb[0].mxu0 }
  0xf5   :  { %v121_v14 = vadd.f32 %v120_v13, %v36_v12  ;;  %v169_v15 = vpop.f32.mrb[1].mxu0 }
  0xf6   :  { %v123_v16 = vpop.f32.mrb[2].mxu0 }
  0xf7   :  { %vm126_vm1 = vcmp.ge.f32.partialorder %v121_v14, 0.0  ;;  %v127_v17 = vmul.f32 0.2, %v121_v14  ;;  %v170_v18 = vpop.f32.mrb[3].mxu0 }
  0xf9   :  { %v128_v19 = vsel %vm126_vm1, %v121_v14, %v127_v17 }
  0xfa   :  { %129 = vst [vmem:[%s242_s3] sm:$0xff] %v128_v19 }

// kernel: model_forward.42
= control target key start
LH: loop header
LB: loop body
LE: loop exit
PB: predicated region body
PF: predicated region fallthrough
CT: control target
= control target key end

     0   :  { %s727_s12 = smov 0   ;;  %s729_s13 = smov 0   ;;  %s863_s0 = inlined_call_operand.vmem [shape: bf16[4,192], index: 0, kind: input, shape index: {}]   ;;  %s864_s1 = inlined_call_operand.vmem [shape: bf16[192,512], index: 1, kind: input, shape index: {}]   ;;  %s865_s2 = inlined_call_operand.vmem [shape: f32[4,1], index: 2, kind: input, shape index: {}]   ;;  %s866_s3 = inlined_call_operand.vmem [shape: f32[4,512], index: 3, kind: output, shape index: {}]  }
   0x1   :  { %s731_s14 = smov 0  }
   0x2 LB: > { %s580_s15 = sadd.s32 4294967295, %s704_s14   ;;  %s744_s16 = sadd.s32 1, %s704_s14   ;;  %s704_s14 = sphi %s731_s14, %s869_s14   ;;  %s700_s13 = sphi %s729_s13, %s868_s13   ;;  %s696_s12 = sphi %s727_s12, %s867_s12  }
   0x3   : > { %s38_s17 = ssub.s32 %s704_s14, %s744_s16  ;;  %s41_s18 = sadd.s32 1, %s700_s13 }
   0x4   : > { %p39_p0 = scmp.eq.s32.totalorder %s38_s17, 0  ;;  %p48_p1 = scmp.ne.s32.totalorder %s700_s13, %s696_s12 }
   0x5   : > { %p49_p2 = scmp.eq.s32.totalorder %s704_s14, 0  ;;  %p583_p4 = scmp.ge.s32.totalorder %s704_s14, 2 }
   0x6   : > { %s753_s19 = scalar_select %p39_p0, %s700_s13, %s41_s18  }
   0x7   : > { %p50_p3 = por %p49_p2, %p48_p1  ;;  %127 = sbr.rel (%p583_p4) target bundleno = 30 (0x1e), region = 24 }
   0xe   : > { %130 = sbr.rel (!%p50_p3) target bundleno = 30 (0x1e), region = 28  ;;  %s132_s20 = sand.u32 (%p50_p3), 1, %s700_s13  }
   0xf   : > { %s617_s21 = sshll.u32 (%p50_p3), %s704_s14, 3  ;;  %s618_s22 = smul.u32 (%p50_p3), 192, %s132_s20 }
  0x10   : > { %s761_s25 = scalar_lea.vmem (%p50_p3), %s864_s1, %s617_s21 }
  0x11   : > { %v211_v0 = vld [vmem:[%s761_s25] sm:$0xff] (%p50_p3)  ;;  %v213_v1 = vld [vmem:[%s761_s25 + $0x10] sm:$0xff] (%p50_p3)  ;;  %s769_s26 = scalar_lea.vmem (%p50_p3), [#allocation2], %s618_s22 }
  0x12   : > { %v215_v2 = vld [vmem:[%s761_s25 + $0x20] sm:$0xff] (%p50_p3)  ;;  %v217_v3 = vld [vmem:[%s761_s25 + $0x30] sm:$0xff] (%p50_p3)  ;;  %212 = vst [vmem:[%s769_s26] sm:$0xff] (%p50_p3), %v211_v0  ;;  %214 = vst [vmem:[%s769_s26 + $0x8] sm:$0xff] (%p50_p3), %v213_v1 }
  0x13   : > { %v219_v4 = vld [vmem:[%s761_s25 + $0x40] sm:$0xff] (%p50_p3)  ;;  %v221_v5 = vld [vmem:[%s761_s25 + $0x50] sm:$0xff] (%p50_p3)  ;;  %216 = vst [vmem:[%s769_s26 + $0x10] sm:$0xff] (%p50_p3), %v215_v2  ;;  %218 = vst [vmem:[%s769_s26 + $0x18] sm:$0xff] (%p50_p3), %v217_v3 }
  0x14   : > { %220 = vst [vmem:[%s769_s26 + $0x20] sm:$0xff] (%p50_p3), %v219_v4  ;;  %222 = vst [vmem:[%s769_s26 + $0x28] sm:$0xff] (%p50_p3), %v221_v5  ;;  %v223_v6 = vld [vmem:[%s761_s25 + $0x60] sm:$0xff] (%p50_p3)  ;;  %v225_v7 = vld [vmem:[%s761_s25 + $0x70] sm:$0xff] (%p50_p3) }
  0x15   : > { %v227_v8 = vld [vmem:[%s761_s25 + $0x80] sm:$0xff]  ;;  %224 = vst [vmem:[%s769_s26 + $0x30] sm:$0xff] %v223_v6  ;;  %226 = vst [vmem:[%s769_s26 + $0x38] sm:$0xff] %v225_v7  ;;  %v229_v9 = vld [vmem:[%s761_s25 + $0x90] sm:$0xff] }
  0x16   : > { %228 = vst [vmem:[%s769_s26 + $0x40] sm:$0xff] %v227_v8  ;;  %v231_v10 = vld [vmem:[%s761_s25 + $0xa0] sm:$0xff]  ;;  %v233_v11 = vld [vmem:[%s761_s25 + $0xb0] sm:$0xff]  ;;  %230 = vst [vmem:[%s769_s26 + $0x48] sm:$0xff] %v229_v9 }
  0x17   : > { %232 = vst [vmem:[%s769_s26 + $0x50] sm:$0xff] %v231_v10  ;;  %234 = vst [vmem:[%s769_s26 + $0x58] sm:$0xff] %v233_v11  ;;  %v235_v12 = vld [vmem:[%s761_s25 + $0xc0] sm:$0xff]  ;;  %v237_v13 = vld [vmem:[%s761_s25 + $0xd0] sm:$0xff] }
  0x18   : > { %v239_v14 = vld [vmem:[%s761_s25 + $0xe0] sm:$0xff]  ;;  %236 = vst [vmem:[%s769_s26 + $0x60] sm:$0xff] %v235_v12  ;;  %238 = vst [vmem:[%s769_s26 + $0x68] sm:$0xff] %v237_v13  ;;  %v241_v15 = vld [vmem:[%s761_s25 + $0xf0] sm:$0xff] }
  0x19   : > { %240 = vst [vmem:[%s769_s26 + $0x70] sm:$0xff] %v239_v14  ;;  %v243_v16 = vld [vmem:[%s761_s25 + $0x100] sm:$0xff]  ;;  %v245_v17 = vld [vmem:[%s761_s25 + $0x110] sm:$0xff]  ;;  %242 = vst [vmem:[%s769_s26 + $0x78] sm:$0xff] %v241_v15 }
  0x1a   : > { %244 = vst [vmem:[%s769_s26 + $0x80] sm:$0xff] %v243_v16  ;;  %246 = vst [vmem:[%s769_s26 + $0x88] sm:$0xff] %v245_v17  ;;  %v247_v18 = vld [vmem:[%s761_s25 + $0x120] sm:$0xff]  ;;  %v249_v19 = vld [vmem:[%s761_s25 + $0x130] sm:$0xff] }
  0x1b   : > { %v251_v20 = vld [vmem:[%s761_s25 + $0x140] sm:$0xff]  ;;  %248 = vst [vmem:[%s769_s26 + $0x90] sm:$0xff] %v247_v18  ;;  %250 = vst [vmem:[%s769_s26 + $0x98] sm:$0xff] %v249_v19  ;;  %v253_v21 = vld [vmem:[%s761_s25 + $0x150] sm:$0xff] }
  0x1c   : > { %252 = vst [vmem:[%s769_s26 + $0xa0] sm:$0xff] %v251_v20  ;;  %v255_v22 = vld [vmem:[%s761_s25 + $0x160] sm:$0xff]  ;;  %v257_v23 = vld [vmem:[%s761_s25 + $0x170] sm:$0xff]  ;;  %254 = vst [vmem:[%s769_s26 + $0xa8] sm:$0xff] %v253_v21 }
  0x1d   : > { %256 = vst [vmem:[%s769_s26 + $0xb0] sm:$0xff] %v255_v22  ;;  %258 = vst [vmem:[%s769_s26 + $0xb8] sm:$0xff] %v257_v23 }
  0x1e PF: > { %p586_p5 = scmp.ge.s32.totalorder %s704_s14, 1  ;;  %p263_p6 = scmp.lt.s32.totalorder %s704_s14, 3 }
  0x20   : > { %p264_p7 = pnand %p586_p5, %p263_p6 }
  0x21   : > { %s270_s27 = sand.u32 (!%p264_p7), 1, %s696_s12   ;;  %v589_v24 = vld.sshfl [vmem:[%s863_s0] sm:$0x33 pattern:$0x76325410] (!%p264_p7)  ;;  %vm462_vm0 = vcmask (!%p264_p7), 523264  }
  0x22   : > { %267 = sbr.rel (%p264_p7) target bundleno = 308 (0x134), region = 66  ;;  %v340_v25 = vcombine.high (!%p264_p7), %v589_v24, %v589_v24  ;;  %v326_v26 = vld [vmem:[%s865_s2] sm:$0xf] (!%p264_p7)  ;;  %v706_v27 = vmov (!%p264_p7), 0   ;;  %s587_s7 = sshll.u32 (!%p264_p7), %s580_s15, 1 }
  0x23   : > { %s619_s30 = smul.u32 (!%p264_p7), 192, %s270_s27  ;;  %645 = vset.pattern.permute.xlu0 (!%p264_p7), %v706_v27  ;;  %p295_p8 = scmp.lt.s32.totalorder (!%p264_p7), %s587_s7, 3 }
  0x24   : > { %614 = vmatprep.mubr.msk.bf16.mxu0 (!%p264_p7), %vm462_vm0, %v340_v25  ;;  %329 = vperm.xlu0 (!%p264_p7), %645, %v326_v26  }
  0x25   : > { %s822_s6 = scalar_lea.vmem (!%p264_p7), [#allocation2], %s619_s30 }
  0x26   : > { %v646_v28 = vld [vmem:[%s822_s6 + $0x4] ss:$8 sps:$4 sm:$0xff] (!%p264_p7)   ;;  %v648_v29 = vld [vmem:[%s822_s6] ss:$8 sps:$4 sm:$0xff] (!%p264_p7)   ;;  %v649_v30 = vld [vmem:[%s822_s6 + $0x14] ss:$8 sps:$4 sm:$0xff] (!%p264_p7)  }
  0x27   : > { %466 = vmatprep.subr.bf16.mxu0 (!%p264_p7), %v646_v28  ;;  %v651_v31 = vld [vmem:[%s822_s6 + $0x10] ss:$8 sps:$4 sm:$0xff] (!%p264_p7)   ;;  %v652_v32 = vld [vmem:[%s822_s6 + $0x24] ss:$8 sps:$4 sm:$0xff] (!%p264_p7)   ;;  %v654_v33 = vld [vmem:[%s822_s6 + $0x20] ss:$8 sps:$4 sm:$0xff] (!%p264_p7)  }
  0x28   : > { %467 = vmatpush1.bf16.msra.mxu0 (!%p264_p7), %v648_v29  ;;  %v655_v34 = vld [vmem:[%s822_s6 + $0x34] ss:$8 sps:$4 sm:$0xff] (!%p264_p7)   ;;  %v657_v35 = vld [vmem:[%s822_s6 + $0x30] ss:$8 sps:$4 sm:$0xff] (!%p264_p7)   ;;  %v658_v36 = vld [vmem:[%s822_s6 + $0x44] ss:$8 sps:$4 sm:$0xff] (!%p264_p7)  }
  0x29   : > { %468 = vmatprep.subr.bf16.mxu0 %v649_v30  ;;  %v660_v37 = vld [vmem:[%s822_s6 + $0x40] ss:$8 sps:$4 sm:$0xff]   ;;  %v661_v38 = vld [vmem:[%s822_s6 + $0x54] ss:$8 sps:$4 sm:$0xff]   ;;  %v663_v39 = vld [vmem:[%s822_s6 + $0x50] ss:$8 sps:$4 sm:$0xff]  }
  0x2a   : > { %v664_v40 = vld [vmem:[%s822_s6 + $0x64] ss:$8 sps:$4 sm:$0xff]   ;;  %v666_v41 = vld [vmem:[%s822_s6 + $0x60] ss:$8 sps:$4 sm:$0xff]   ;;  %v667_v42 = vld [vmem:[%s822_s6 + $0x74] ss:$8 sps:$4 sm:$0xff]  }
  0x2b   : > { %v669_v43 = vld [vmem:[%s822_s6 + $0x70] ss:$8 sps:$4 sm:$0xff]   ;;  %v670_v44 = vld [vmem:[%s822_s6 + $0x84] ss:$8 sps:$4 sm:$0xff]   ;;  %v672_v45 = vld [vmem:[%s822_s6 + $0x80] ss:$8 sps:$4 sm:$0xff]  }
  0x2c   : > { %469 = vmatpush1.bf16.msra.mxu0 %v651_v31  ;;  %v673_v46 = vld [vmem:[%s822_s6 + $0x94] ss:$8 sps:$4 sm:$0xff]   ;;  %v675_v47 = vld [vmem:[%s822_s6 + $0x90] ss:$8 sps:$4 sm:$0xff]   ;;  %v676_v48 = vld [vmem:[%s822_s6 + $0xa4] ss:$8 sps:$4 sm:$0xff]  }
  0x2d   : > { %470 = vmatprep.subr.bf16.mxu0 %v652_v32  ;;  %v678_v49 = vld [vmem:[%s822_s6 + $0xa0] ss:$8 sps:$4 sm:$0xff]   ;;  %v679_v50 = vld [vmem:[%s822_s6 + $0xb4] ss:$8 sps:$4 sm:$0xff]   ;;  %v681_v51 = vld [vmem:[%s822_s6 + $0xb0] ss:$8 sps:$4 sm:$0xff]  }
  0x2e   : > { %s871_s7 = smov (!%p295_p8, %s587_s7), 3 }
  0x2f   : > { %s588_s8 = sshll.u32 %s871_s7, 2 }
  0x30   : > { %471 = vmatpush1.bf16.msra.mxu0 %v654_v33  ;;  %s298_s11 = scalar_lea.vmem %s866_s3, %s588_s8 }
  0x31   : > { %472 = vmatprep.subr.bf16.mxu0 %v655_v34 }
  0x34   : > { %473 = vmatpush1.bf16.msra.mxu0 %v657_v35 }
  0x35   : > { %474 = vmatprep.subr.bf16.mxu0 %v658_v36 }
  0x38   : > { %475 = vmatpush1.bf16.msra.mxu0 %v660_v37 }
  0x39   : > { %476 = vmatprep.subr.bf16.mxu0 %v661_v38 }
  0x3c   : > { %477 = vmatpush1.bf16.msra.mxu0 %v663_v39 }
  0x3d   : > { %478 = vmatprep.subr.bf16.mxu0 %v664_v40 }
  0x40   : > { %479 = vmatpush1.bf16.msra.mxu0 %v666_v41 }
  0x41   : > { %480 = vmatprep.subr.bf16.mxu0 %v667_v42 }
  0x44   : > { %481 = vmatpush1.bf16.msra.mxu0 %v669_v43 }
  0x45   : > { %482 = vmatprep.subr.bf16.mxu0 %v670_v44 }
  0x48   : > { %483 = vmatpush1.bf16.msra.mxu0 %v672_v45 }
  0x49   : > { %484 = vmatprep.subr.bf16.mxu0 %v673_v46 }
  0x4c   : > { %485 = vmatpush1.bf16.msra.mxu0 %v675_v47 }
  0x4d   : > { %486 = vmatprep.subr.bf16.mxu0 %v676_v48 }
  0x50   : > { %487 = vmatpush1.bf16.msra.mxu0 %v678_v49 }
  0x51   : > { %488 = vmatprep.subr.bf16.mxu0 %v679_v50 }
  0x54   : > { %489 = vmatpush1.bf16.msra.mxu0 %v681_v51 }
  0x57   : > { %499 = vmatmul.mubr.bf16.vlgmr.msra.gmra.mrb[0].mxu0 %v589_v24 }
  0xa3   : > { %v330_v52 = vpop.permute.xlu0 %329 }
 0x12a   : > { %v500_v53 = vpop.f32.mrb[0].mxu0 }
 0x12b   : > { %v501_v54 = vadd.f32 %v500_v53, %v330_v52  ;;  %v502_v55 = vpop.f32.mrb[1].mxu0 }
 0x12c   : > { %v503_v56 = vadd.f32 %v502_v55, %v330_v52  ;;  %v504_v57 = vpop.f32.mrb[2].mxu0 }
 0x12d   : > { %vm507_vm1 = vcmp.ge.f32.partialorder %v501_v54, 0.0  ;;  %v509_v58 = vmul.f32 0.2, %v501_v54  ;;  %v505_v59 = vpop.f32.mrb[3].mxu0 }
 0x12e   : > { %vm508_vm2 = vcmp.ge.f32.partialorder %v503_v56, 0.0  ;;  %v510_v60 = vmul.f32 0.2, %v503_v56 }
 0x12f   : > { %v511_v61 = vsel %vm507_vm1, %v501_v54, %v509_v58 }
 0x130   : > { %v512_v62 = vsel %vm508_vm2, %v503_v56, %v510_v60 }
 0x131   : > { %v515_v63 = vcombine.low %v511_v61, %v512_v62 }
 0x133   : > { %517 = vst [vmem:[%s298_s11] sm:$0xff] %v515_v63 }
 0x134 PF: > { %p10_p9 = scmp.ge.s32.totalorder %s744_s16, 4   ;;  %s867_s12 = smov %s700_s13 }
 0x135   : > { %s868_s13 = smov %s753_s19  ;;  %s869_s14 = smov %s744_s16 }
 0x136   :  { %12 = sbr.rel (!%p10_p9) target bundleno = 2 (0x2), region = 105 }

// kernel: model_forward.43
= control target key start
LH: loop header
LB: loop body
LE: loop exit
PB: predicated region body
PF: predicated region fallthrough
CT: control target
= control target key end

     0   :  { %s396_s14 = smov 0   ;;  %s420_s0 = inlined_call_operand.vmem [shape: bf16[1,4], index: 0, kind: input, shape index: {}]   ;;  %s421_s1 = inlined_call_operand.vmem [shape: bf16[4,512], index: 1, kind: input, shape index: {}]   ;;  %s422_s2 = inlined_call_operand.<no memory space> [shape: f32[1,1], index: 2, kind: input, shape index: {}]   ;;  %s423_s3 = inlined_call_operand.vmem [shape: f32[1,512], index: 3, kind: output, shape index: {}]  }
   0x1   :  { %v8_v0 = vstv %s422_s2 }
   0x2   :  { %9 = vst [vmem:[#allocation2] sm:$0x1] %v8_v0 }
   0x3 LB: > { %s335_s15 = sadd.s32 4294967295, %s369_s14   ;;  %p339_p0 = scmp.ge.s32.totalorder %s369_s14, 1  ;;  %s369_s14 = sphi %s396_s14, %s15_s14  }
   0x4   : > { %p140_p1 = scmp.lt.s32.totalorder %s369_s14, 3 }
   0x6   : > { %p141_p2 = pnand %p339_p0, %p140_p1 }
   0x7   : > { %s340_s16 = sshll.u32 (!%p141_p2), %s335_s15, 1  ;;  %v371_v1 = vmov (!%p141_p2), 0   ;;  %vm200_vm0 = vcmask (!%p141_p2), 1041408   ;;  %v175_v6 = vld [vmem:[%s420_s0] sm:$0x1] (!%p141_p2)  ;;  %vm196_vm1 = vcmask (!%p141_p2), 31744   ;;  %v183_v7 = vlaneseq (!%p141_p2) }
   0x8   : > { %144 = sbr.rel (%p141_p2) target bundleno = 267 (0x10b), region = 32  ;;  %p164_p3 = scmp.lt.s32.totalorder (!%p141_p2), %s340_s16, 3  ;;  %239 = vmatprep.mubr.bf16.mxu0 (!%p141_p2), %v371_v1  ;;  %358 = vset.pattern.permute.xlu0 (!%p141_p2), %v371_v1  ;;  %v372_v26 = vmov (!%p141_p2), 1966171168  }
   0x9   : > { %v177_v2 = vld [vmem:[#allocation2] sm:$0x1] (!%p141_p2)  ;;  %v184_v8 = vshrl.u32 (!%p141_p2), %v183_v7, 7  ;;  %v266_v27 = vunpack.c.l.s4 (!%p141_p2), %v372_v26  ;;  %vm282_vm4 = vcmp.lt.s32.totalorder (!%p141_p2), %v183_v7, 256 }
   0xa   : > { %180 = vperm.xlu0 (!%p141_p2), %358, %v177_v2  }
   0xb   : > { %v185_v9 = vsub.s32 (!%p141_p2), 0, %v184_v8  ;;  %v267_v28 = vunpack.c.0.s8 (!%p141_p2), %v266_v27 }
   0xd   : > { %v270_v32 = vsub.s32 (!%p141_p2), %v267_v28, %v184_v8 }
   0xf   : > { %s425_s16 = smov (!%p164_p3, %s340_s16), 3 }
  0x10   : > { %s341_s2 = sshll.u32 %s425_s16, 1  ;;  %s172_s24 = scalar_lea.vmem %s423_s3, %s425_s16 }
  0x11   : > { %s167_s19 = scalar_lea.vmem %s421_s1, %s341_s2 }
  0x12   : > { %v343_v3 = vld.sshfl [vmem:[%s167_s19] sm:$0x33 pattern:$0x76325410] }
  0x13   : > { %v195_v4 = vcombine.high %v343_v3, %v343_v3  ;;  %v202_v5 = vsel %vm200_vm0, %v343_v3, 0 }
  0x15   : > { %344 = vmatprep.subr.msk.bf16.mxu0 %vm200_vm0, %v195_v4 }
  0x16   : > { %208 = vmatpush1.bf16.msra.mxu0 %v202_v5 }
  0x19   : > { %345 = vmatmul.mubr.msk.bf16.vlgmr.msra.gmra.mrb[0].mxu0 %vm196_vm1, %v175_v6 }
  0x89   : > { %v181_v10 = vpop.permute.xlu0 %180 }
  0x8a   : > { %v186_v11 = vrot.slane %v181_v10, %v185_v9 }
  0xec   : > { %v241_v12 = vpop.f32.mrb[0].mxu0 }
  0xed   : > { %v242_v13 = vadd.f32 %v241_v12, %v186_v11  ;;  %v243_v14 = vpop.f32.mrb[1].mxu0 }
  0xee   : > { %v244_v15 = vadd.f32 %v243_v14, %v186_v11  ;;  %v245_v16 = vpop.f32.mrb[2].mxu0 }
  0xef   : > { %vm248_vm2 = vcmp.ge.f32.partialorder %v242_v13, 0.0  ;;  %v250_v17 = vmul.f32 0.2, %v242_v13  ;;  %v246_v18 = vpop.f32.mrb[3].mxu0 }
  0xf0   : > { %vm249_vm3 = vcmp.ge.f32.partialorder %v244_v15, 0.0  ;;  %v251_v19 = vmul.f32 0.2, %v244_v15 }
  0xf1   : > { %v252_v20 = vsel %vm248_vm2, %v242_v13, %v250_v17 }
  0xf2   : > { %v254_v21 = vmul.f32 0.14391157, %v252_v20  ;;  %v253_v22 = vsel %vm249_vm3, %v244_v15, %v251_v19 }
  0xf3   : > { %v255_v23 = vmul.f32 0.14391157, %v253_v22 }
  0xf4   : > { %v256_v24 = vmul.f32 1.442695, %v254_v21 }
  0xf5   : > { %v258_v25 = vmul.f32 1.442695, %v255_v23 }
  0xf6   : > { %359 = vpow2.f32 %v256_v24 }
  0xf7   : > { %361 = vpow2.f32 %v258_v25 }
 0x100   : > { %v360_v29 = vpop.eup %359 }
 0x101   : > { %v362_v30 = vpop.eup %361  ;;  %v260_v31 = vmul.f32 0.036463324, %v360_v29 }
 0x102   : > { %v261_v33 = vmul.f32 0.036463324, %v362_v30 }
 0x104   : > { %v264_v34 = vcombine.low %v260_v31, %v261_v33 }
 0x106   : > { %v271_v35 = vrot.slane %v264_v34, %v270_v32 }
 0x108   : > { %v278_v36 = vrot.slane %v271_v35, %v270_v32 }
 0x10a   : > { %284 = vst.msk [vmem:[%s172_s24] sm:$0x3] %vm282_vm4, %v278_v36 }
 0x10b PF: > { %s15_s14 = sadd.s32 1, %s369_s14  }
 0x10c   : > { %p12_p4 = scmp.ge.s32.totalorder %s15_s14, 4  }
 0x10e   :  { %14 = sbr.rel (!%p12_p4) target bundleno = 3 (0x3), region = 62 }

</bundles_post_ra>
